<compile_context>
chip_gen: v7x
topology: tpu7x:2x2x1
jax: 0.10.0
libtpu: 0.0.40
codegen_flags: <defaults>
</compile_context>

<pallas_src>
import jax
import jax.numpy as jnp
from jax.experimental import pallas as pl
from jax.experimental.pallas import tpu as pltpu

# ---------------- small synthetic Dinov2WithRegisters config ----------------
IMG = 16          # image_size
PATCH = 8         # patch_size
C_IN = 3          # num_channels
HIDDEN = 32       # hidden_size
N_HEADS = 4       # num_attention_heads
HEAD_DIM = HIDDEN // N_HEADS
N_LAYERS = 2      # num_hidden_layers
MLP_DIM = 4 * HIDDEN  # mlp_ratio = 4
N_REG = 4         # num_register_tokens
EPS = 1e-6        # layer_norm_eps
N_PATCH_SIDE = IMG // PATCH
N_PATCHES = N_PATCH_SIDE * N_PATCH_SIDE
SEQ = 1 + N_REG + N_PATCHES          # 9 real rows per image
SEQ_PAD = 16                         # padded to a sublane multiple
ATTN_SCALE = 1.0 / (HEAD_DIM ** 0.5)
PATCH_DIM = C_IN * PATCH * PATCH
LANE_PAD = 128                       # lane-dense output width


# ---------------- in-kernel math helpers ----------------
def _gelu_tanh(x):
    # tanh-approx GELU (per perf review): EUP tanh, ~1e-3 max delta vs exact erf GELU.
    return 0.5 * x * (1.0 + jnp.tanh(0.7978845608028654 * (x + 0.044715 * x * x * x)))


def _layernorm(x, w, b):
    mu = jnp.mean(x, axis=-1, keepdims=True)
    xc = x - mu
    var = jnp.mean(xc * xc, axis=-1, keepdims=True)
    return xc * jax.lax.rsqrt(var + EPS) * w + b


# ---------------- fused Pallas kernel (one grid step = one image) ----------------
def _kernel(xp_ref, pw_ref, base_ref, kmask_ref,
            qkvw_ref, qkvb_ref, ow_ref, f1w_ref, f1b_ref, f2w_ref,
            vec_ref, fln_ref, o_ref):
    bf16 = jnp.bfloat16

    # Patch-embed conv (stride=PATCH) as one matmul over all SEQ_PAD rows.
    # cls/register/padding rows carry zero pixels; `base` carries cls+pos / registers /
    # patch pos-emb + conv-bias (and zeros for padding rows).
    x = (jnp.dot(xp_ref[...].astype(bf16), pw_ref[...],
                 preferred_element_type=jnp.float32)
         + base_ref[...])                                       # (SEQ_PAD, HIDDEN) f32

    kmask = kmask_ref[...]                                      # (SEQ_PAD, SEQ_PAD) additive

    for l in range(N_LAYERS):                                   # unrolled, weights resident
        vec = vec_ref[l]                                        # (8, HIDDEN) packed vectors
        ln1w, ln1b = vec[0:1, :], vec[1:2, :]
        o_b,  ls1  = vec[2:3, :], vec[3:4, :]
        ln2w, ln2b = vec[4:5, :], vec[5:6, :]
        f2b,  ls2  = vec[6:7, :], vec[7:8, :]
        qkvw_l, qkvb_l = qkvw_ref[l], qkvb_ref[l]
        ow_l = ow_ref[l]
        f1w_l, f1b_l = f1w_ref[l], f1b_ref[l]
        f2w_l = f2w_ref[l]

        # --- self-attention block ---
        h = _layernorm(x, ln1w, ln1b)
        qkv = (jnp.dot(h.astype(bf16), qkvw_l, preferred_element_type=jnp.float32)
               + qkvb_l)                                        # (SEQ_PAD, 3*HIDDEN) f32

        attn = None
        for hh in range(N_HEADS):
            lo = hh * HEAD_DIM
            qh = qkv[:, lo:lo + HEAD_DIM]                       # scale folded in at pack time
            kh = qkv[:, HIDDEN + lo:HIDDEN + lo + HEAD_DIM]
            vh = qkv[:, 2 * HIDDEN + lo:2 * HIDDEN + lo + HEAD_DIM]
            # q @ k^T without materializing a transposed tile.
            s = jax.lax.dot_general(qh, kh, (((1,), (1,)), ((), ())),
                                    preferred_element_type=jnp.float32) + kmask
            s = s - jnp.max(s, axis=-1, keepdims=True)
            p = jnp.exp(s)
            p = p * pl.reciprocal(jnp.sum(p, axis=-1, keepdims=True), approx=True)
            ctx_h = jnp.dot(p, vh, preferred_element_type=jnp.float32)   # (SEQ_PAD, HEAD_DIM)
            # Per-head partial output projection: avoids the lane-concat of head outputs.
            part = jnp.dot(ctx_h.astype(bf16), ow_l[lo:lo + HEAD_DIM, :],
                           preferred_element_type=jnp.float32)
            attn = part if attn is None else attn + part

        x = x + (attn + o_b) * ls1                              # LayerScale1 + residual

        # --- MLP block ---
        h2 = _layernorm(x, ln2w, ln2b)
        m = _gelu_tanh(jnp.dot(h2.astype(bf16), f1w_l,
                               preferred_element_type=jnp.float32) + f1b_l)
        m = jnp.dot(m.astype(bf16), f2w_l, preferred_element_type=jnp.float32) + f2b
        x = x + m * ls2                                         # LayerScale2 + residual

    fln = fln_ref[...]
    x = _layernorm(x, fln[0:1, :], fln[1:2, :])

    # Lane-dense 128-wide output: zero the block, then partial-store the 32 real lanes.
    o_ref[...] = jnp.zeros((SEQ_PAD, LANE_PAD), jnp.float32)
    o_ref[:, :HIDDEN] = x.astype(o_ref.dtype)


# ---------------- one-time parameter packing (NOT in the per-call path) ----------------
def pack_params(params):
    lyr = params["layers"]
    # QKV fused into one (H, 3H) matmul; ATTN_SCALE folded into the Q block.
    qkvw = jnp.stack([jnp.concatenate(
        [lp["q_w"] * ATTN_SCALE, lp["k_w"], lp["v_w"]], axis=1) for lp in lyr])
    qkvb = jnp.stack([jnp.concatenate(
        [lp["q_b"] * ATTN_SCALE, lp["k_b"], lp["v_b"]], axis=1) for lp in lyr])
    ow = jnp.stack([lp["o_w"] for lp in lyr])
    f1w = jnp.stack([lp["fc1_w"] for lp in lyr])
    f1b = jnp.stack([lp["fc1_b"] for lp in lyr])
    f2w = jnp.stack([lp["fc2_w"] for lp in lyr])
    vec = jnp.stack([jnp.concatenate(
        [lp["ln1_w"], lp["ln1_b"], lp["o_b"], lp["ls1"],
         lp["ln2_w"], lp["ln2_b"], lp["fc2_b"], lp["ls2"]], axis=0) for lp in lyr])
    fln = jnp.concatenate([params["ln_w"], params["ln_b"]], axis=0)

    # Additive base rows: [cls+pos0, registers (no pos), patch pos + conv bias, 0-padding]
    prefix = jnp.concatenate(
        [params["cls_token"][0] + params["pos_emb"][0, :1, :], params["reg_tokens"][0]],
        axis=0)                                                   # (1+N_REG, H)
    patch_bias = params["pos_emb"][0, 1:, :] + params["patch_b"]  # (N_PATCHES, H)
    base = jnp.concatenate([prefix, patch_bias], axis=0)          # (SEQ, H)
    base = jnp.pad(base, ((0, SEQ_PAD - SEQ), (0, 0)))            # (SEQ_PAD, H)

    # Additive key mask: padding key columns never attended to (f32, kept off bf16 path).
    col = jnp.arange(SEQ_PAD)
    kmask = jnp.where(col[None, :] < SEQ, 0.0, -1e9).astype(jnp.float32)
    kmask = jnp.broadcast_to(kmask, (SEQ_PAD, SEQ_PAD))

    bf16 = jnp.bfloat16
    f32 = jnp.float32
    return {
        "pw": params["patch_w"].astype(bf16),   # MXU operands stored bf16
        "base": base.astype(f32),
        "kmask": kmask,
        "qkvw": qkvw.astype(bf16), "qkvb": qkvb.astype(f32),
        "ow": ow.astype(bf16),
        "f1w": f1w.astype(bf16), "f1b": f1b.astype(f32),
        "f2w": f2w.astype(bf16),
        "vec": vec.astype(f32), "fln": fln.astype(f32),
    }


# ---------------- jitted forward: patchify + one fused pallas_call ----------------
@jax.jit
def dinov2_encoder(pixel_values, packed):
    B = pixel_values.shape[0]

    # patchify NCHW -> (B, Np, C*P*P), row-major over patch grid
    # (matches conv2d(stride=P) -> flatten(2) -> transpose(1,2))
    xp = pixel_values.reshape(B, C_IN, N_PATCH_SIDE, PATCH, N_PATCH_SIDE, PATCH)
    xp = xp.transpose(0, 2, 4, 1, 3, 5).reshape(B, N_PATCHES, PATCH_DIM)
    # rows: [cls, reg x4, patches x4, pad x(SEQ_PAD-SEQ)]; non-patch rows carry zero pixels
    xp_full = jnp.pad(xp, ((0, 0), (1 + N_REG, SEQ_PAD - SEQ), (0, 0)))
    xp_full = xp_full.reshape(B * SEQ_PAD, PATCH_DIM)

    # Blocked BlockSpecs place every operand in VMEM; weights use a constant block index
    # so they stay resident across the batch grid (no per-step re-DMA).
    out = pl.pallas_call(
        _kernel,
        grid=(B,),
        in_specs=[
            pl.BlockSpec((SEQ_PAD, PATCH_DIM), lambda b: (b, 0)),            # pixels (per image)
            pl.BlockSpec((PATCH_DIM, HIDDEN), lambda b: (0, 0)),             # patch-embed weight
            pl.BlockSpec((SEQ_PAD, HIDDEN), lambda b: (0, 0)),               # additive base
            pl.BlockSpec((SEQ_PAD, SEQ_PAD), lambda b: (0, 0)),              # key padding mask
            pl.BlockSpec((N_LAYERS, HIDDEN, 3 * HIDDEN), lambda b: (0, 0, 0)),  # qkv w
            pl.BlockSpec((N_LAYERS, 1, 3 * HIDDEN), lambda b: (0, 0, 0)),       # qkv b
            pl.BlockSpec((N_LAYERS, HIDDEN, HIDDEN), lambda b: (0, 0, 0)),      # out-proj w
            pl.BlockSpec((N_LAYERS, HIDDEN, MLP_DIM), lambda b: (0, 0, 0)),     # fc1 w
            pl.BlockSpec((N_LAYERS, 1, MLP_DIM), lambda b: (0, 0, 0)),          # fc1 b
            pl.BlockSpec((N_LAYERS, MLP_DIM, HIDDEN), lambda b: (0, 0, 0)),     # fc2 w
            pl.BlockSpec((N_LAYERS, 8, HIDDEN), lambda b: (0, 0, 0)),           # packed vectors
            pl.BlockSpec((2, HIDDEN), lambda b: (0, 0)),                        # final LN
        ],
        out_specs=pl.BlockSpec((SEQ_PAD, LANE_PAD), lambda b: (b, 0)),
        out_shape=jax.ShapeDtypeStruct((B * SEQ_PAD, LANE_PAD), jnp.float32),
        compiler_params=pltpu.CompilerParams(
            dimension_semantics=("parallel",),       # batch sharded across TCs on v7x
            vmem_limit_bytes=8 * 1024 * 1024,        # actual footprint ~0.2 MiB; headroom
        ),
    )(xp_full, packed["pw"], packed["base"], packed["kmask"],
      packed["qkvw"], packed["qkvb"], packed["ow"],
      packed["f1w"], packed["f1b"], packed["f2w"],
      packed["vec"], packed["fln"])

    h = out[:, :HIDDEN].reshape(B, SEQ_PAD, HIDDEN)[:, :SEQ]
    pooled = h[:, 0]  # CLS token after final LayerNorm
    return h, pooled


# ---------------- deterministic synthetic parameter init ----------------
def init_params(key):
    keys = iter(jax.random.split(key, 256))

    def nrm(shape, scale=0.02):
        return (scale * jax.random.normal(next(keys), shape)).astype(jnp.float32)

    params = {
        # conv weight (H, C, P, P) reshaped to (H, C*P*P) then transposed -> (C*P*P, H)
        "patch_w": nrm((PATCH_DIM, HIDDEN)),
        "patch_b": nrm((1, HIDDEN)),
        "cls_token": nrm((1, 1, HIDDEN)),
        "reg_tokens": jnp.zeros((1, N_REG, HIDDEN), jnp.float32),
        "pos_emb": nrm((1, 1 + N_PATCHES, HIDDEN)),
        "ln_w": jnp.ones((1, HIDDEN), jnp.float32),
        "ln_b": jnp.zeros((1, HIDDEN), jnp.float32),
        "layers": [],
    }
    for _ in range(N_LAYERS):
        params["layers"].append({
            "ln1_w": jnp.ones((1, HIDDEN), jnp.float32),
            "ln1_b": jnp.zeros((1, HIDDEN), jnp.float32),
            "q_w": nrm((HIDDEN, HIDDEN)), "q_b": nrm((1, HIDDEN)),
            "k_w": nrm((HIDDEN, HIDDEN)), "k_b": nrm((1, HIDDEN)),
            "v_w": nrm((HIDDEN, HIDDEN)), "v_b": nrm((1, HIDDEN)),
            "o_w": nrm((HIDDEN, HIDDEN)), "o_b": nrm((1, HIDDEN)),
            "ls1": jnp.full((1, HIDDEN), 1.0, jnp.float32),   # layerscale_value = 1.0
            "ln2_w": jnp.ones((1, HIDDEN), jnp.float32),
            "ln2_b": jnp.zeros((1, HIDDEN), jnp.float32),
            "fc1_w": nrm((HIDDEN, MLP_DIM)), "fc1_b": nrm((1, MLP_DIM)),
            "fc2_w": nrm((MLP_DIM, HIDDEN)), "fc2_b": nrm((1, HIDDEN)),
            "ls2": jnp.full((1, HIDDEN), 1.0, jnp.float32),
        })
    return params


if __name__ == "__main__":
    key = jax.random.PRNGKey(0)
    k_params, k_pix = jax.random.split(key)
    params = init_params(k_params)
    packed = pack_params(params)          # one-time pack; NOT part of the per-call path
    packed = jax.tree_util.tree_map(jnp.asarray, packed)

    pixel_values = jax.random.normal(k_pix, (2, C_IN, IMG, IMG), dtype=jnp.float32)

    last_hidden_state, pooled = dinov2_encoder(pixel_values, packed)
    jax.block_until_ready((last_hidden_state, pooled))

    assert last_hidden_state.shape == (2, SEQ, HIDDEN)
    assert pooled.shape == (2, HIDDEN)
    assert bool(jnp.all(jnp.isfinite(last_hidden_state)))
    assert bool(jnp.all(jnp.isfinite(pooled)))
    print("KERNEL_OK")
</pallas_src>

<mosaic_0001>
module attributes {stable_mosaic.version = 11 : i64} {
  func.func @_kernel(%arg0: i32, %arg1: memref<16x192xf32, #tpu.memory_space<vmem>>, %arg2: memref<192x32xbf16, #tpu.memory_space<vmem>>, %arg3: memref<16x32xf32, #tpu.memory_space<vmem>>, %arg4: memref<16x16xf32, #tpu.memory_space<vmem>>, %arg5: memref<2x32x96xbf16, #tpu.memory_space<vmem>>, %arg6: memref<2x1x96xf32, #tpu.memory_space<vmem>>, %arg7: memref<2x32x32xbf16, #tpu.memory_space<vmem>>, %arg8: memref<2x32x128xbf16, #tpu.memory_space<vmem>>, %arg9: memref<2x1x128xf32, #tpu.memory_space<vmem>>, %arg10: memref<2x128x32xbf16, #tpu.memory_space<vmem>>, %arg11: memref<2x8x32xf32, #tpu.memory_space<vmem>>, %arg12: memref<2x32xf32, #tpu.memory_space<vmem>>, %arg13: memref<16x128xf32, #tpu.memory_space<vmem>>) attributes {dimension_semantics = [#tpu.dimension_semantics<parallel>], iteration_bounds = array<i64: 2>, scalar_prefetch = 0 : i64, scratch_operands = 0 : i64, tpu.core_type = #tpu.core_type<tc>, window_params = [{transform_indices = @transform_0, window_bounds = array<i64: 16, 192>}, {pipeline_mode = #tpu.pipeline_mode<synchronous>, transform_indices = @transform_1, window_bounds = array<i64: 192, 32>}, {pipeline_mode = #tpu.pipeline_mode<synchronous>, transform_indices = @transform_2, window_bounds = array<i64: 16, 32>}, {pipeline_mode = #tpu.pipeline_mode<synchronous>, transform_indices = @transform_3, window_bounds = array<i64: 16, 16>}, {pipeline_mode = #tpu.pipeline_mode<synchronous>, transform_indices = @transform_4, window_bounds = array<i64: 2, 32, 96>}, {pipeline_mode = #tpu.pipeline_mode<synchronous>, transform_indices = @transform_5, window_bounds = array<i64: 2, 1, 96>}, {pipeline_mode = #tpu.pipeline_mode<synchronous>, transform_indices = @transform_6, window_bounds = array<i64: 2, 32, 32>}, {pipeline_mode = #tpu.pipeline_mode<synchronous>, transform_indices = @transform_7, window_bounds = array<i64: 2, 32, 128>}, {pipeline_mode = #tpu.pipeline_mode<synchronous>, transform_indices = @transform_8, window_bounds = array<i64: 2, 1, 128>}, {pipeline_mode = #tpu.pipeline_mode<synchronous>, transform_indices = @transform_9, window_bounds = array<i64: 2, 128, 32>}, {pipeline_mode = #tpu.pipeline_mode<synchronous>, transform_indices = @transform_10, window_bounds = array<i64: 2, 8, 32>}, {pipeline_mode = #tpu.pipeline_mode<synchronous>, transform_indices = @transform_11, window_bounds = array<i64: 2, 32>}, {transform_indices = @transform_12, window_bounds = array<i64: 16, 128>}]} {
    %c0 = arith.constant 0 : index
    %c0_0 = arith.constant 0 : index
    %0 = vector.load %arg1[%c0, %c0_0] : memref<16x192xf32, #tpu.memory_space<vmem>>, vector<16x192xf32>
    %1 = arith.truncf %0 : vector<16x192xf32> to vector<16x192xbf16>
    %c0_1 = arith.constant 0 : index
    %c0_2 = arith.constant 0 : index
    %2 = vector.load %arg2[%c0_1, %c0_2] : memref<192x32xbf16, #tpu.memory_space<vmem>>, vector<192x32xbf16>
    %cst = arith.constant dense<0.000000e+00> : vector<16x32xf32>
    %3 = tpu.matmul %1, %2, %cst {dimension_numbers = #tpu.dot_dimension_numbers<[1], [0], [0], [1], [0, 0, 1, 1], [], []>} : vector<16x192xbf16>, vector<192x32xbf16>, vector<16x32xf32> -> vector<16x32xf32>
    %c0_3 = arith.constant 0 : index
    %c0_4 = arith.constant 0 : index
    %4 = vector.load %arg3[%c0_3, %c0_4] : memref<16x32xf32, #tpu.memory_space<vmem>>, vector<16x32xf32>
    %5 = arith.addf %3, %4 : vector<16x32xf32>
    %c0_5 = arith.constant 0 : index
    %c0_6 = arith.constant 0 : index
    %6 = vector.load %arg4[%c0_5, %c0_6] : memref<16x16xf32, #tpu.memory_space<vmem>>, vector<16x16xf32>
    %c0_7 = arith.constant 0 : index
    %c0_8 = arith.constant 0 : index
    %c0_9 = arith.constant 0 : index
    %7 = vector.load %arg11[%c0_7, %c0_8, %c0_9] : memref<2x8x32xf32, #tpu.memory_space<vmem>>, vector<1x8x32xf32>
    %8 = vector.shape_cast %7 : vector<1x8x32xf32> to vector<8x32xf32>
    %9 = vector.extract_strided_slice %8 {offsets = [0, 0], sizes = [1, 32], strides = [1, 1]} : vector<8x32xf32> to vector<1x32xf32>
    %10 = vector.extract_strided_slice %8 {offsets = [1, 0], sizes = [1, 32], strides = [1, 1]} : vector<8x32xf32> to vector<1x32xf32>
    %11 = vector.extract_strided_slice %8 {offsets = [2, 0], sizes = [1, 32], strides = [1, 1]} : vector<8x32xf32> to vector<1x32xf32>
    %12 = vector.extract_strided_slice %8 {offsets = [3, 0], sizes = [1, 32], strides = [1, 1]} : vector<8x32xf32> to vector<1x32xf32>
    %13 = vector.extract_strided_slice %8 {offsets = [4, 0], sizes = [1, 32], strides = [1, 1]} : vector<8x32xf32> to vector<1x32xf32>
    %14 = vector.extract_strided_slice %8 {offsets = [5, 0], sizes = [1, 32], strides = [1, 1]} : vector<8x32xf32> to vector<1x32xf32>
    %15 = vector.extract_strided_slice %8 {offsets = [6, 0], sizes = [1, 32], strides = [1, 1]} : vector<8x32xf32> to vector<1x32xf32>
    %16 = vector.extract_strided_slice %8 {offsets = [7, 0], sizes = [1, 32], strides = [1, 1]} : vector<8x32xf32> to vector<1x32xf32>
    %c0_10 = arith.constant 0 : index
    %c0_11 = arith.constant 0 : index
    %c0_12 = arith.constant 0 : index
    %17 = vector.load %arg5[%c0_10, %c0_11, %c0_12] : memref<2x32x96xbf16, #tpu.memory_space<vmem>>, vector<1x32x96xbf16>
    %18 = vector.shape_cast %17 : vector<1x32x96xbf16> to vector<32x96xbf16>
    %c0_13 = arith.constant 0 : index
    %c0_14 = arith.constant 0 : index
    %c0_15 = arith.constant 0 : index
    %19 = vector.load %arg6[%c0_13, %c0_14, %c0_15] : memref<2x1x96xf32, #tpu.memory_space<vmem>>, vector<1x1x96xf32>
    %20 = vector.shape_cast %19 : vector<1x1x96xf32> to vector<1x96xf32>
    %c0_16 = arith.constant 0 : index
    %c0_17 = arith.constant 0 : index
    %c0_18 = arith.constant 0 : index
    %21 = vector.load %arg7[%c0_16, %c0_17, %c0_18] : memref<2x32x32xbf16, #tpu.memory_space<vmem>>, vector<1x32x32xbf16>
    %22 = vector.shape_cast %21 : vector<1x32x32xbf16> to vector<32x32xbf16>
    %c0_19 = arith.constant 0 : index
    %c0_20 = arith.constant 0 : index
    %c0_21 = arith.constant 0 : index
    %23 = vector.load %arg8[%c0_19, %c0_20, %c0_21] : memref<2x32x128xbf16, #tpu.memory_space<vmem>>, vector<1x32x128xbf16>
    %24 = vector.shape_cast %23 : vector<1x32x128xbf16> to vector<32x128xbf16>
    %c0_22 = arith.constant 0 : index
    %c0_23 = arith.constant 0 : index
    %c0_24 = arith.constant 0 : index
    %25 = vector.load %arg9[%c0_22, %c0_23, %c0_24] : memref<2x1x128xf32, #tpu.memory_space<vmem>>, vector<1x1x128xf32>
    %26 = vector.shape_cast %25 : vector<1x1x128xf32> to vector<1x128xf32>
    %c0_25 = arith.constant 0 : index
    %c0_26 = arith.constant 0 : index
    %c0_27 = arith.constant 0 : index
    %27 = vector.load %arg10[%c0_25, %c0_26, %c0_27] : memref<2x128x32xbf16, #tpu.memory_space<vmem>>, vector<1x128x32xbf16>
    %28 = vector.shape_cast %27 : vector<1x128x32xbf16> to vector<128x32xbf16>
    %cst_28 = arith.constant dense<0.000000e+00> : vector<16xf32>
    %29 = vector.multi_reduction <add>, %5, %cst_28 [1] : vector<16x32xf32> to vector<16xf32>
    %30 = vector.shape_cast %29 : vector<16xf32> to vector<16x1xf32>
    %cst_29 = arith.constant 3.200000e+01 : f32
    %31 = vector.broadcast %cst_29 : f32 to vector<16x1xf32>
    %32 = arith.divf %30, %31 : vector<16x1xf32>
    %33 = vector.broadcast %32 : vector<16x1xf32> to vector<16x32xf32>
    %34 = arith.subf %5, %33 : vector<16x32xf32>
    %35 = arith.mulf %34, %34 : vector<16x32xf32>
    %cst_30 = arith.constant dense<0.000000e+00> : vector<16xf32>
    %36 = vector.multi_reduction <add>, %35, %cst_30 [1] : vector<16x32xf32> to vector<16xf32>
    %37 = vector.shape_cast %36 : vector<16xf32> to vector<16x1xf32>
    %cst_31 = arith.constant 3.200000e+01 : f32
    %38 = vector.broadcast %cst_31 : f32 to vector<16x1xf32>
    %39 = arith.divf %37, %38 : vector<16x1xf32>
    %cst_32 = arith.constant 9.99999997E-7 : f32
    %40 = vector.broadcast %cst_32 : f32 to vector<16x1xf32>
    %41 = arith.addf %39, %40 : vector<16x1xf32>
    %42 = math.rsqrt %41 : vector<16x1xf32>
    %43 = vector.broadcast %42 : vector<16x1xf32> to vector<16x32xf32>
    %44 = arith.mulf %34, %43 : vector<16x32xf32>
    %45 = vector.broadcast %9 : vector<1x32xf32> to vector<16x32xf32>
    %46 = arith.mulf %44, %45 : vector<16x32xf32>
    %47 = vector.broadcast %10 : vector<1x32xf32> to vector<16x32xf32>
    %48 = arith.addf %46, %47 : vector<16x32xf32>
    %49 = arith.truncf %48 : vector<16x32xf32> to vector<16x32xbf16>
    %cst_33 = arith.constant dense<0.000000e+00> : vector<16x96xf32>
    %50 = tpu.matmul %49, %18, %cst_33 {dimension_numbers = #tpu.dot_dimension_numbers<[1], [0], [0], [1], [0, 0, 1, 1], [], []>} : vector<16x32xbf16>, vector<32x96xbf16>, vector<16x96xf32> -> vector<16x96xf32>
    %51 = vector.broadcast %20 : vector<1x96xf32> to vector<16x96xf32>
    %52 = arith.addf %50, %51 : vector<16x96xf32>
    %53 = vector.extract_strided_slice %52 {offsets = [0, 0], sizes = [16, 8], strides = [1, 1]} : vector<16x96xf32> to vector<16x8xf32>
    %54 = vector.extract_strided_slice %52 {offsets = [0, 32], sizes = [16, 8], strides = [1, 1]} : vector<16x96xf32> to vector<16x8xf32>
    %55 = vector.extract_strided_slice %52 {offsets = [0, 64], sizes = [16, 8], strides = [1, 1]} : vector<16x96xf32> to vector<16x8xf32>
    %cst_34 = arith.constant dense<0.000000e+00> : vector<16x16xf32>
    %56 = tpu.matmul %53, %54, %cst_34 {dimension_numbers = #tpu.dot_dimension_numbers<[1], [1], [0], [0], [0, 0, 1, 0], [], []>} : vector<16x8xf32>, vector<16x8xf32>, vector<16x16xf32> -> vector<16x16xf32>
    %57 = arith.addf %56, %6 : vector<16x16xf32>
    %cst_35 = arith.constant dense<0xFF800000> : vector<16xf32>
    %58 = vector.multi_reduction <maximumf>, %57, %cst_35 [1] : vector<16x16xf32> to vector<16xf32>
    %59 = vector.shape_cast %58 : vector<16xf32> to vector<16x1xf32>
    %60 = vector.broadcast %59 : vector<16x1xf32> to vector<16x16xf32>
    %61 = arith.subf %57, %60 : vector<16x16xf32>
    %62 = math.exp %61 : vector<16x16xf32>
    %cst_36 = arith.constant dense<0.000000e+00> : vector<16xf32>
    %63 = vector.multi_reduction <add>, %62, %cst_36 [1] : vector<16x16xf32> to vector<16xf32>
    %64 = vector.shape_cast %63 : vector<16xf32> to vector<16x1xf32>
    %65 = tpu.reciprocal %64 {approx = true} : vector<16x1xf32> -> vector<16x1xf32>
    %66 = vector.broadcast %65 : vector<16x1xf32> to vector<16x16xf32>
    %67 = arith.mulf %62, %66 : vector<16x16xf32>
    %cst_37 = arith.constant dense<0.000000e+00> : vector<16x8xf32>
    %68 = tpu.matmul %67, %55, %cst_37 {dimension_numbers = #tpu.dot_dimension_numbers<[1], [0], [0], [1], [0, 0, 1, 1], [], []>} : vector<16x16xf32>, vector<16x8xf32>, vector<16x8xf32> -> vector<16x8xf32>
    %69 = arith.truncf %68 : vector<16x8xf32> to vector<16x8xbf16>
    %70 = vector.extract_strided_slice %22 {offsets = [0, 0], sizes = [8, 32], strides = [1, 1]} : vector<32x32xbf16> to vector<8x32xbf16>
    %cst_38 = arith.constant dense<0.000000e+00> : vector<16x32xf32>
    %71 = tpu.matmul %69, %70, %cst_38 {dimension_numbers = #tpu.dot_dimension_numbers<[1], [0], [0], [1], [0, 0, 1, 1], [], []>} : vector<16x8xbf16>, vector<8x32xbf16>, vector<16x32xf32> -> vector<16x32xf32>
    %72 = vector.extract_strided_slice %52 {offsets = [0, 8], sizes = [16, 8], strides = [1, 1]} : vector<16x96xf32> to vector<16x8xf32>
    %73 = vector.extract_strided_slice %52 {offsets = [0, 40], sizes = [16, 8], strides = [1, 1]} : vector<16x96xf32> to vector<16x8xf32>
    %74 = vector.extract_strided_slice %52 {offsets = [0, 72], sizes = [16, 8], strides = [1, 1]} : vector<16x96xf32> to vector<16x8xf32>
    %cst_39 = arith.constant dense<0.000000e+00> : vector<16x16xf32>
    %75 = tpu.matmul %72, %73, %cst_39 {dimension_numbers = #tpu.dot_dimension_numbers<[1], [1], [0], [0], [0, 0, 1, 0], [], []>} : vector<16x8xf32>, vector<16x8xf32>, vector<16x16xf32> -> vector<16x16xf32>
    %76 = arith.addf %75, %6 : vector<16x16xf32>
    %cst_40 = arith.constant dense<0xFF800000> : vector<16xf32>
    %77 = vector.multi_reduction <maximumf>, %76, %cst_40 [1] : vector<16x16xf32> to vector<16xf32>
    %78 = vector.shape_cast %77 : vector<16xf32> to vector<16x1xf32>
    %79 = vector.broadcast %78 : vector<16x1xf32> to vector<16x16xf32>
    %80 = arith.subf %76, %79 : vector<16x16xf32>
    %81 = math.exp %80 : vector<16x16xf32>
    %cst_41 = arith.constant dense<0.000000e+00> : vector<16xf32>
    %82 = vector.multi_reduction <add>, %81, %cst_41 [1] : vector<16x16xf32> to vector<16xf32>
    %83 = vector.shape_cast %82 : vector<16xf32> to vector<16x1xf32>
    %84 = tpu.reciprocal %83 {approx = true} : vector<16x1xf32> -> vector<16x1xf32>
    %85 = vector.broadcast %84 : vector<16x1xf32> to vector<16x16xf32>
    %86 = arith.mulf %81, %85 : vector<16x16xf32>
    %cst_42 = arith.constant dense<0.000000e+00> : vector<16x8xf32>
    %87 = tpu.matmul %86, %74, %cst_42 {dimension_numbers = #tpu.dot_dimension_numbers<[1], [0], [0], [1], [0, 0, 1, 1], [], []>} : vector<16x16xf32>, vector<16x8xf32>, vector<16x8xf32> -> vector<16x8xf32>
    %88 = arith.truncf %87 : vector<16x8xf32> to vector<16x8xbf16>
    %89 = vector.extract_strided_slice %22 {offsets = [8, 0], sizes = [8, 32], strides = [1, 1]} : vector<32x32xbf16> to vector<8x32xbf16>
    %cst_43 = arith.constant dense<0.000000e+00> : vector<16x32xf32>
    %90 = tpu.matmul %88, %89, %cst_43 {dimension_numbers = #tpu.dot_dimension_numbers<[1], [0], [0], [1], [0, 0, 1, 1], [], []>} : vector<16x8xbf16>, vector<8x32xbf16>, vector<16x32xf32> -> vector<16x32xf32>
    %91 = arith.addf %71, %90 : vector<16x32xf32>
    %92 = vector.extract_strided_slice %52 {offsets = [0, 16], sizes = [16, 8], strides = [1, 1]} : vector<16x96xf32> to vector<16x8xf32>
    %93 = vector.extract_strided_slice %52 {offsets = [0, 48], sizes = [16, 8], strides = [1, 1]} : vector<16x96xf32> to vector<16x8xf32>
    %94 = vector.extract_strided_slice %52 {offsets = [0, 80], sizes = [16, 8], strides = [1, 1]} : vector<16x96xf32> to vector<16x8xf32>
    %cst_44 = arith.constant dense<0.000000e+00> : vector<16x16xf32>
    %95 = tpu.matmul %92, %93, %cst_44 {dimension_numbers = #tpu.dot_dimension_numbers<[1], [1], [0], [0], [0, 0, 1, 0], [], []>} : vector<16x8xf32>, vector<16x8xf32>, vector<16x16xf32> -> vector<16x16xf32>
    %96 = arith.addf %95, %6 : vector<16x16xf32>
    %cst_45 = arith.constant dense<0xFF800000> : vector<16xf32>
    %97 = vector.multi_reduction <maximumf>, %96, %cst_45 [1] : vector<16x16xf32> to vector<16xf32>
    %98 = vector.shape_cast %97 : vector<16xf32> to vector<16x1xf32>
    %99 = vector.broadcast %98 : vector<16x1xf32> to vector<16x16xf32>
    %100 = arith.subf %96, %99 : vector<16x16xf32>
    %101 = math.exp %100 : vector<16x16xf32>
    %cst_46 = arith.constant dense<0.000000e+00> : vector<16xf32>
    %102 = vector.multi_reduction <add>, %101, %cst_46 [1] : vector<16x16xf32> to vector<16xf32>
    %103 = vector.shape_cast %102 : vector<16xf32> to vector<16x1xf32>
    %104 = tpu.reciprocal %103 {approx = true} : vector<16x1xf32> -> vector<16x1xf32>
    %105 = vector.broadcast %104 : vector<16x1xf32> to vector<16x16xf32>
    %106 = arith.mulf %101, %105 : vector<16x16xf32>
    %cst_47 = arith.constant dense<0.000000e+00> : vector<16x8xf32>
    %107 = tpu.matmul %106, %94, %cst_47 {dimension_numbers = #tpu.dot_dimension_numbers<[1], [0], [0], [1], [0, 0, 1, 1], [], []>} : vector<16x16xf32>, vector<16x8xf32>, vector<16x8xf32> -> vector<16x8xf32>
    %108 = arith.truncf %107 : vector<16x8xf32> to vector<16x8xbf16>
    %109 = vector.extract_strided_slice %22 {offsets = [16, 0], sizes = [8, 32], strides = [1, 1]} : vector<32x32xbf16> to vector<8x32xbf16>
    %cst_48 = arith.constant dense<0.000000e+00> : vector<16x32xf32>
    %110 = tpu.matmul %108, %109, %cst_48 {dimension_numbers = #tpu.dot_dimension_numbers<[1], [0], [0], [1], [0, 0, 1, 1], [], []>} : vector<16x8xbf16>, vector<8x32xbf16>, vector<16x32xf32> -> vector<16x32xf32>
    %111 = arith.addf %91, %110 : vector<16x32xf32>
    %112 = vector.extract_strided_slice %52 {offsets = [0, 24], sizes = [16, 8], strides = [1, 1]} : vector<16x96xf32> to vector<16x8xf32>
    %113 = vector.extract_strided_slice %52 {offsets = [0, 56], sizes = [16, 8], strides = [1, 1]} : vector<16x96xf32> to vector<16x8xf32>
    %114 = vector.extract_strided_slice %52 {offsets = [0, 88], sizes = [16, 8], strides = [1, 1]} : vector<16x96xf32> to vector<16x8xf32>
    %cst_49 = arith.constant dense<0.000000e+00> : vector<16x16xf32>
    %115 = tpu.matmul %112, %113, %cst_49 {dimension_numbers = #tpu.dot_dimension_numbers<[1], [1], [0], [0], [0, 0, 1, 0], [], []>} : vector<16x8xf32>, vector<16x8xf32>, vector<16x16xf32> -> vector<16x16xf32>
    %116 = arith.addf %115, %6 : vector<16x16xf32>
    %cst_50 = arith.constant dense<0xFF800000> : vector<16xf32>
    %117 = vector.multi_reduction <maximumf>, %116, %cst_50 [1] : vector<16x16xf32> to vector<16xf32>
    %118 = vector.shape_cast %117 : vector<16xf32> to vector<16x1xf32>
    %119 = vector.broadcast %118 : vector<16x1xf32> to vector<16x16xf32>
    %120 = arith.subf %116, %119 : vector<16x16xf32>
    %121 = math.exp %120 : vector<16x16xf32>
    %cst_51 = arith.constant dense<0.000000e+00> : vector<16xf32>
    %122 = vector.multi_reduction <add>, %121, %cst_51 [1] : vector<16x16xf32> to vector<16xf32>
    %123 = vector.shape_cast %122 : vector<16xf32> to vector<16x1xf32>
    %124 = tpu.reciprocal %123 {approx = true} : vector<16x1xf32> -> vector<16x1xf32>
    %125 = vector.broadcast %124 : vector<16x1xf32> to vector<16x16xf32>
    %126 = arith.mulf %121, %125 : vector<16x16xf32>
    %cst_52 = arith.constant dense<0.000000e+00> : vector<16x8xf32>
    %127 = tpu.matmul %126, %114, %cst_52 {dimension_numbers = #tpu.dot_dimension_numbers<[1], [0], [0], [1], [0, 0, 1, 1], [], []>} : vector<16x16xf32>, vector<16x8xf32>, vector<16x8xf32> -> vector<16x8xf32>
    %128 = arith.truncf %127 : vector<16x8xf32> to vector<16x8xbf16>
    %129 = vector.extract_strided_slice %22 {offsets = [24, 0], sizes = [8, 32], strides = [1, 1]} : vector<32x32xbf16> to vector<8x32xbf16>
    %cst_53 = arith.constant dense<0.000000e+00> : vector<16x32xf32>
    %130 = tpu.matmul %128, %129, %cst_53 {dimension_numbers = #tpu.dot_dimension_numbers<[1], [0], [0], [1], [0, 0, 1, 1], [], []>} : vector<16x8xbf16>, vector<8x32xbf16>, vector<16x32xf32> -> vector<16x32xf32>
    %131 = arith.addf %111, %130 : vector<16x32xf32>
    %132 = vector.broadcast %11 : vector<1x32xf32> to vector<16x32xf32>
    %133 = arith.addf %131, %132 : vector<16x32xf32>
    %134 = vector.broadcast %12 : vector<1x32xf32> to vector<16x32xf32>
    %135 = arith.mulf %133, %134 : vector<16x32xf32>
    %136 = arith.addf %5, %135 : vector<16x32xf32>
    %cst_54 = arith.constant dense<0.000000e+00> : vector<16xf32>
    %137 = vector.multi_reduction <add>, %136, %cst_54 [1] : vector<16x32xf32> to vector<16xf32>
    %138 = vector.shape_cast %137 : vector<16xf32> to vector<16x1xf32>
    %cst_55 = arith.constant 3.200000e+01 : f32
    %139 = vector.broadcast %cst_55 : f32 to vector<16x1xf32>
    %140 = arith.divf %138, %139 : vector<16x1xf32>
    %141 = vector.broadcast %140 : vector<16x1xf32> to vector<16x32xf32>
    %142 = arith.subf %136, %141 : vector<16x32xf32>
    %143 = arith.mulf %142, %142 : vector<16x32xf32>
    %cst_56 = arith.constant dense<0.000000e+00> : vector<16xf32>
    %144 = vector.multi_reduction <add>, %143, %cst_56 [1] : vector<16x32xf32> to vector<16xf32>
    %145 = vector.shape_cast %144 : vector<16xf32> to vector<16x1xf32>
    %cst_57 = arith.constant 3.200000e+01 : f32
    %146 = vector.broadcast %cst_57 : f32 to vector<16x1xf32>
    %147 = arith.divf %145, %146 : vector<16x1xf32>
    %cst_58 = arith.constant 9.99999997E-7 : f32
    %148 = vector.broadcast %cst_58 : f32 to vector<16x1xf32>
    %149 = arith.addf %147, %148 : vector<16x1xf32>
    %150 = math.rsqrt %149 : vector<16x1xf32>
    %151 = vector.broadcast %150 : vector<16x1xf32> to vector<16x32xf32>
    %152 = arith.mulf %142, %151 : vector<16x32xf32>
    %153 = vector.broadcast %13 : vector<1x32xf32> to vector<16x32xf32>
    %154 = arith.mulf %152, %153 : vector<16x32xf32>
    %155 = vector.broadcast %14 : vector<1x32xf32> to vector<16x32xf32>
    %156 = arith.addf %154, %155 : vector<16x32xf32>
    %157 = arith.truncf %156 : vector<16x32xf32> to vector<16x32xbf16>
    %cst_59 = arith.constant dense<0.000000e+00> : vector<16x128xf32>
    %158 = tpu.matmul %157, %24, %cst_59 {dimension_numbers = #tpu.dot_dimension_numbers<[1], [0], [0], [1], [0, 0, 1, 1], [], []>} : vector<16x32xbf16>, vector<32x128xbf16>, vector<16x128xf32> -> vector<16x128xf32>
    %159 = vector.broadcast %26 : vector<1x128xf32> to vector<16x128xf32>
    %160 = arith.addf %158, %159 : vector<16x128xf32>
    %cst_60 = arith.constant 5.000000e-01 : f32
    %161 = vector.broadcast %cst_60 : f32 to vector<16x128xf32>
    %162 = arith.mulf %161, %160 : vector<16x128xf32>
    %cst_61 = arith.constant 4.471500e-02 : f32
    %163 = vector.broadcast %cst_61 : f32 to vector<16x128xf32>
    %164 = arith.mulf %163, %160 : vector<16x128xf32>
    %165 = arith.mulf %164, %160 : vector<16x128xf32>
    %166 = arith.mulf %165, %160 : vector<16x128xf32>
    %167 = arith.addf %160, %166 : vector<16x128xf32>
    %cst_62 = arith.constant 0.797884583 : f32
    %168 = vector.broadcast %cst_62 : f32 to vector<16x128xf32>
    %169 = arith.mulf %168, %167 : vector<16x128xf32>
    %170 = math.tanh %169 : vector<16x128xf32>
    %cst_63 = arith.constant 1.000000e+00 : f32
    %171 = vector.broadcast %cst_63 : f32 to vector<16x128xf32>
    %172 = arith.addf %171, %170 : vector<16x128xf32>
    %173 = arith.mulf %162, %172 : vector<16x128xf32>
    %174 = arith.truncf %173 : vector<16x128xf32> to vector<16x128xbf16>
    %cst_64 = arith.constant dense<0.000000e+00> : vector<16x32xf32>
    %175 = tpu.matmul %174, %28, %cst_64 {dimension_numbers = #tpu.dot_dimension_numbers<[1], [0], [0], [1], [0, 0, 1, 1], [], []>} : vector<16x128xbf16>, vector<128x32xbf16>, vector<16x32xf32> -> vector<16x32xf32>
    %176 = vector.broadcast %15 : vector<1x32xf32> to vector<16x32xf32>
    %177 = arith.addf %175, %176 : vector<16x32xf32>
    %178 = vector.broadcast %16 : vector<1x32xf32> to vector<16x32xf32>
    %179 = arith.mulf %177, %178 : vector<16x32xf32>
    %180 = arith.addf %136, %179 : vector<16x32xf32>
    %c1 = arith.constant 1 : index
    %c0_65 = arith.constant 0 : index
    %c0_66 = arith.constant 0 : index
    %181 = vector.load %arg11[%c1, %c0_65, %c0_66] : memref<2x8x32xf32, #tpu.memory_space<vmem>>, vector<1x8x32xf32>
    %182 = vector.shape_cast %181 : vector<1x8x32xf32> to vector<8x32xf32>
    %183 = vector.extract_strided_slice %182 {offsets = [0, 0], sizes = [1, 32], strides = [1, 1]} : vector<8x32xf32> to vector<1x32xf32>
    %184 = vector.extract_strided_slice %182 {offsets = [1, 0], sizes = [1, 32], strides = [1, 1]} : vector<8x32xf32> to vector<1x32xf32>
    %185 = vector.extract_strided_slice %182 {offsets = [2, 0], sizes = [1, 32], strides = [1, 1]} : vector<8x32xf32> to vector<1x32xf32>
    %186 = vector.extract_strided_slice %182 {offsets = [3, 0], sizes = [1, 32], strides = [1, 1]} : vector<8x32xf32> to vector<1x32xf32>
    %187 = vector.extract_strided_slice %182 {offsets = [4, 0], sizes = [1, 32], strides = [1, 1]} : vector<8x32xf32> to vector<1x32xf32>
    %188 = vector.extract_strided_slice %182 {offsets = [5, 0], sizes = [1, 32], strides = [1, 1]} : vector<8x32xf32> to vector<1x32xf32>
    %189 = vector.extract_strided_slice %182 {offsets = [6, 0], sizes = [1, 32], strides = [1, 1]} : vector<8x32xf32> to vector<1x32xf32>
    %190 = vector.extract_strided_slice %182 {offsets = [7, 0], sizes = [1, 32], strides = [1, 1]} : vector<8x32xf32> to vector<1x32xf32>
    %c1_67 = arith.constant 1 : index
    %c0_68 = arith.constant 0 : index
    %c0_69 = arith.constant 0 : index
    %191 = vector.load %arg5[%c1_67, %c0_68, %c0_69] : memref<2x32x96xbf16, #tpu.memory_space<vmem>>, vector<1x32x96xbf16>
    %192 = vector.shape_cast %191 : vector<1x32x96xbf16> to vector<32x96xbf16>
    %c1_70 = arith.constant 1 : index
    %c0_71 = arith.constant 0 : index
    %c0_72 = arith.constant 0 : index
    %193 = vector.load %arg6[%c1_70, %c0_71, %c0_72] : memref<2x1x96xf32, #tpu.memory_space<vmem>>, vector<1x1x96xf32>
    %194 = vector.shape_cast %193 : vector<1x1x96xf32> to vector<1x96xf32>
    %c1_73 = arith.constant 1 : index
    %c0_74 = arith.constant 0 : index
    %c0_75 = arith.constant 0 : index
    %195 = vector.load %arg7[%c1_73, %c0_74, %c0_75] : memref<2x32x32xbf16, #tpu.memory_space<vmem>>, vector<1x32x32xbf16>
    %196 = vector.shape_cast %195 : vector<1x32x32xbf16> to vector<32x32xbf16>
    %c1_76 = arith.constant 1 : index
    %c0_77 = arith.constant 0 : index
    %c0_78 = arith.constant 0 : index
    %197 = vector.load %arg8[%c1_76, %c0_77, %c0_78] : memref<2x32x128xbf16, #tpu.memory_space<vmem>>, vector<1x32x128xbf16>
    %198 = vector.shape_cast %197 : vector<1x32x128xbf16> to vector<32x128xbf16>
    %c1_79 = arith.constant 1 : index
    %c0_80 = arith.constant 0 : index
    %c0_81 = arith.constant 0 : index
    %199 = vector.load %arg9[%c1_79, %c0_80, %c0_81] : memref<2x1x128xf32, #tpu.memory_space<vmem>>, vector<1x1x128xf32>
    %200 = vector.shape_cast %199 : vector<1x1x128xf32> to vector<1x128xf32>
    %c1_82 = arith.constant 1 : index
    %c0_83 = arith.constant 0 : index
    %c0_84 = arith.constant 0 : index
    %201 = vector.load %arg10[%c1_82, %c0_83, %c0_84] : memref<2x128x32xbf16, #tpu.memory_space<vmem>>, vector<1x128x32xbf16>
    %202 = vector.shape_cast %201 : vector<1x128x32xbf16> to vector<128x32xbf16>
    %cst_85 = arith.constant dense<0.000000e+00> : vector<16xf32>
    %203 = vector.multi_reduction <add>, %180, %cst_85 [1] : vector<16x32xf32> to vector<16xf32>
    %204 = vector.shape_cast %203 : vector<16xf32> to vector<16x1xf32>
    %cst_86 = arith.constant 3.200000e+01 : f32
    %205 = vector.broadcast %cst_86 : f32 to vector<16x1xf32>
    %206 = arith.divf %204, %205 : vector<16x1xf32>
    %207 = vector.broadcast %206 : vector<16x1xf32> to vector<16x32xf32>
    %208 = arith.subf %180, %207 : vector<16x32xf32>
    %209 = arith.mulf %208, %208 : vector<16x32xf32>
    %cst_87 = arith.constant dense<0.000000e+00> : vector<16xf32>
    %210 = vector.multi_reduction <add>, %209, %cst_87 [1] : vector<16x32xf32> to vector<16xf32>
    %211 = vector.shape_cast %210 : vector<16xf32> to vector<16x1xf32>
    %cst_88 = arith.constant 3.200000e+01 : f32
    %212 = vector.broadcast %cst_88 : f32 to vector<16x1xf32>
    %213 = arith.divf %211, %212 : vector<16x1xf32>
    %cst_89 = arith.constant 9.99999997E-7 : f32
    %214 = vector.broadcast %cst_89 : f32 to vector<16x1xf32>
    %215 = arith.addf %213, %214 : vector<16x1xf32>
    %216 = math.rsqrt %215 : vector<16x1xf32>
    %217 = vector.broadcast %216 : vector<16x1xf32> to vector<16x32xf32>
    %218 = arith.mulf %208, %217 : vector<16x32xf32>
    %219 = vector.broadcast %183 : vector<1x32xf32> to vector<16x32xf32>
    %220 = arith.mulf %218, %219 : vector<16x32xf32>
    %221 = vector.broadcast %184 : vector<1x32xf32> to vector<16x32xf32>
    %222 = arith.addf %220, %221 : vector<16x32xf32>
    %223 = arith.truncf %222 : vector<16x32xf32> to vector<16x32xbf16>
    %cst_90 = arith.constant dense<0.000000e+00> : vector<16x96xf32>
    %224 = tpu.matmul %223, %192, %cst_90 {dimension_numbers = #tpu.dot_dimension_numbers<[1], [0], [0], [1], [0, 0, 1, 1], [], []>} : vector<16x32xbf16>, vector<32x96xbf16>, vector<16x96xf32> -> vector<16x96xf32>
    %225 = vector.broadcast %194 : vector<1x96xf32> to vector<16x96xf32>
    %226 = arith.addf %224, %225 : vector<16x96xf32>
    %227 = vector.extract_strided_slice %226 {offsets = [0, 0], sizes = [16, 8], strides = [1, 1]} : vector<16x96xf32> to vector<16x8xf32>
    %228 = vector.extract_strided_slice %226 {offsets = [0, 32], sizes = [16, 8], strides = [1, 1]} : vector<16x96xf32> to vector<16x8xf32>
    %229 = vector.extract_strided_slice %226 {offsets = [0, 64], sizes = [16, 8], strides = [1, 1]} : vector<16x96xf32> to vector<16x8xf32>
    %cst_91 = arith.constant dense<0.000000e+00> : vector<16x16xf32>
    %230 = tpu.matmul %227, %228, %cst_91 {dimension_numbers = #tpu.dot_dimension_numbers<[1], [1], [0], [0], [0, 0, 1, 0], [], []>} : vector<16x8xf32>, vector<16x8xf32>, vector<16x16xf32> -> vector<16x16xf32>
    %231 = arith.addf %230, %6 : vector<16x16xf32>
    %cst_92 = arith.constant dense<0xFF800000> : vector<16xf32>
    %232 = vector.multi_reduction <maximumf>, %231, %cst_92 [1] : vector<16x16xf32> to vector<16xf32>
    %233 = vector.shape_cast %232 : vector<16xf32> to vector<16x1xf32>
    %234 = vector.broadcast %233 : vector<16x1xf32> to vector<16x16xf32>
    %235 = arith.subf %231, %234 : vector<16x16xf32>
    %236 = math.exp %235 : vector<16x16xf32>
    %cst_93 = arith.constant dense<0.000000e+00> : vector<16xf32>
    %237 = vector.multi_reduction <add>, %236, %cst_93 [1] : vector<16x16xf32> to vector<16xf32>
    %238 = vector.shape_cast %237 : vector<16xf32> to vector<16x1xf32>
    %239 = tpu.reciprocal %238 {approx = true} : vector<16x1xf32> -> vector<16x1xf32>
    %240 = vector.broadcast %239 : vector<16x1xf32> to vector<16x16xf32>
    %241 = arith.mulf %236, %240 : vector<16x16xf32>
    %cst_94 = arith.constant dense<0.000000e+00> : vector<16x8xf32>
    %242 = tpu.matmul %241, %229, %cst_94 {dimension_numbers = #tpu.dot_dimension_numbers<[1], [0], [0], [1], [0, 0, 1, 1], [], []>} : vector<16x16xf32>, vector<16x8xf32>, vector<16x8xf32> -> vector<16x8xf32>
    %243 = arith.truncf %242 : vector<16x8xf32> to vector<16x8xbf16>
    %244 = vector.extract_strided_slice %196 {offsets = [0, 0], sizes = [8, 32], strides = [1, 1]} : vector<32x32xbf16> to vector<8x32xbf16>
    %cst_95 = arith.constant dense<0.000000e+00> : vector<16x32xf32>
    %245 = tpu.matmul %243, %244, %cst_95 {dimension_numbers = #tpu.dot_dimension_numbers<[1], [0], [0], [1], [0, 0, 1, 1], [], []>} : vector<16x8xbf16>, vector<8x32xbf16>, vector<16x32xf32> -> vector<16x32xf32>
    %246 = vector.extract_strided_slice %226 {offsets = [0, 8], sizes = [16, 8], strides = [1, 1]} : vector<16x96xf32> to vector<16x8xf32>
    %247 = vector.extract_strided_slice %226 {offsets = [0, 40], sizes = [16, 8], strides = [1, 1]} : vector<16x96xf32> to vector<16x8xf32>
    %248 = vector.extract_strided_slice %226 {offsets = [0, 72], sizes = [16, 8], strides = [1, 1]} : vector<16x96xf32> to vector<16x8xf32>
    %cst_96 = arith.constant dense<0.000000e+00> : vector<16x16xf32>
    %249 = tpu.matmul %246, %247, %cst_96 {dimension_numbers = #tpu.dot_dimension_numbers<[1], [1], [0], [0], [0, 0, 1, 0], [], []>} : vector<16x8xf32>, vector<16x8xf32>, vector<16x16xf32> -> vector<16x16xf32>
    %250 = arith.addf %249, %6 : vector<16x16xf32>
    %cst_97 = arith.constant dense<0xFF800000> : vector<16xf32>
    %251 = vector.multi_reduction <maximumf>, %250, %cst_97 [1] : vector<16x16xf32> to vector<16xf32>
    %252 = vector.shape_cast %251 : vector<16xf32> to vector<16x1xf32>
    %253 = vector.broadcast %252 : vector<16x1xf32> to vector<16x16xf32>
    %254 = arith.subf %250, %253 : vector<16x16xf32>
    %255 = math.exp %254 : vector<16x16xf32>
    %cst_98 = arith.constant dense<0.000000e+00> : vector<16xf32>
    %256 = vector.multi_reduction <add>, %255, %cst_98 [1] : vector<16x16xf32> to vector<16xf32>
    %257 = vector.shape_cast %256 : vector<16xf32> to vector<16x1xf32>
    %258 = tpu.reciprocal %257 {approx = true} : vector<16x1xf32> -> vector<16x1xf32>
    %259 = vector.broadcast %258 : vector<16x1xf32> to vector<16x16xf32>
    %260 = arith.mulf %255, %259 : vector<16x16xf32>
    %cst_99 = arith.constant dense<0.000000e+00> : vector<16x8xf32>
    %261 = tpu.matmul %260, %248, %cst_99 {dimension_numbers = #tpu.dot_dimension_numbers<[1], [0], [0], [1], [0, 0, 1, 1], [], []>} : vector<16x16xf32>, vector<16x8xf32>, vector<16x8xf32> -> vector<16x8xf32>
    %262 = arith.truncf %261 : vector<16x8xf32> to vector<16x8xbf16>
    %263 = vector.extract_strided_slice %196 {offsets = [8, 0], sizes = [8, 32], strides = [1, 1]} : vector<32x32xbf16> to vector<8x32xbf16>
    %cst_100 = arith.constant dense<0.000000e+00> : vector<16x32xf32>
    %264 = tpu.matmul %262, %263, %cst_100 {dimension_numbers = #tpu.dot_dimension_numbers<[1], [0], [0], [1], [0, 0, 1, 1], [], []>} : vector<16x8xbf16>, vector<8x32xbf16>, vector<16x32xf32> -> vector<16x32xf32>
    %265 = arith.addf %245, %264 : vector<16x32xf32>
    %266 = vector.extract_strided_slice %226 {offsets = [0, 16], sizes = [16, 8], strides = [1, 1]} : vector<16x96xf32> to vector<16x8xf32>
    %267 = vector.extract_strided_slice %226 {offsets = [0, 48], sizes = [16, 8], strides = [1, 1]} : vector<16x96xf32> to vector<16x8xf32>
    %268 = vector.extract_strided_slice %226 {offsets = [0, 80], sizes = [16, 8], strides = [1, 1]} : vector<16x96xf32> to vector<16x8xf32>
    %cst_101 = arith.constant dense<0.000000e+00> : vector<16x16xf32>
    %269 = tpu.matmul %266, %267, %cst_101 {dimension_numbers = #tpu.dot_dimension_numbers<[1], [1], [0], [0], [0, 0, 1, 0], [], []>} : vector<16x8xf32>, vector<16x8xf32>, vector<16x16xf32> -> vector<16x16xf32>
    %270 = arith.addf %269, %6 : vector<16x16xf32>
    %cst_102 = arith.constant dense<0xFF800000> : vector<16xf32>
    %271 = vector.multi_reduction <maximumf>, %270, %cst_102 [1] : vector<16x16xf32> to vector<16xf32>
    %272 = vector.shape_cast %271 : vector<16xf32> to vector<16x1xf32>
    %273 = vector.broadcast %272 : vector<16x1xf32> to vector<16x16xf32>
    %274 = arith.subf %270, %273 : vector<16x16xf32>
    %275 = math.exp %274 : vector<16x16xf32>
    %cst_103 = arith.constant dense<0.000000e+00> : vector<16xf32>
    %276 = vector.multi_reduction <add>, %275, %cst_103 [1] : vector<16x16xf32> to vector<16xf32>
    %277 = vector.shape_cast %276 : vector<16xf32> to vector<16x1xf32>
    %278 = tpu.reciprocal %277 {approx = true} : vector<16x1xf32> -> vector<16x1xf32>
    %279 = vector.broadcast %278 : vector<16x1xf32> to vector<16x16xf32>
    %280 = arith.mulf %275, %279 : vector<16x16xf32>
    %cst_104 = arith.constant dense<0.000000e+00> : vector<16x8xf32>
    %281 = tpu.matmul %280, %268, %cst_104 {dimension_numbers = #tpu.dot_dimension_numbers<[1], [0], [0], [1], [0, 0, 1, 1], [], []>} : vector<16x16xf32>, vector<16x8xf32>, vector<16x8xf32> -> vector<16x8xf32>
    %282 = arith.truncf %281 : vector<16x8xf32> to vector<16x8xbf16>
    %283 = vector.extract_strided_slice %196 {offsets = [16, 0], sizes = [8, 32], strides = [1, 1]} : vector<32x32xbf16> to vector<8x32xbf16>
    %cst_105 = arith.constant dense<0.000000e+00> : vector<16x32xf32>
    %284 = tpu.matmul %282, %283, %cst_105 {dimension_numbers = #tpu.dot_dimension_numbers<[1], [0], [0], [1], [0, 0, 1, 1], [], []>} : vector<16x8xbf16>, vector<8x32xbf16>, vector<16x32xf32> -> vector<16x32xf32>
    %285 = arith.addf %265, %284 : vector<16x32xf32>
    %286 = vector.extract_strided_slice %226 {offsets = [0, 24], sizes = [16, 8], strides = [1, 1]} : vector<16x96xf32> to vector<16x8xf32>
    %287 = vector.extract_strided_slice %226 {offsets = [0, 56], sizes = [16, 8], strides = [1, 1]} : vector<16x96xf32> to vector<16x8xf32>
    %288 = vector.extract_strided_slice %226 {offsets = [0, 88], sizes = [16, 8], strides = [1, 1]} : vector<16x96xf32> to vector<16x8xf32>
    %cst_106 = arith.constant dense<0.000000e+00> : vector<16x16xf32>
    %289 = tpu.matmul %286, %287, %cst_106 {dimension_numbers = #tpu.dot_dimension_numbers<[1], [1], [0], [0], [0, 0, 1, 0], [], []>} : vector<16x8xf32>, vector<16x8xf32>, vector<16x16xf32> -> vector<16x16xf32>
    %290 = arith.addf %289, %6 : vector<16x16xf32>
    %cst_107 = arith.constant dense<0xFF800000> : vector<16xf32>
    %291 = vector.multi_reduction <maximumf>, %290, %cst_107 [1] : vector<16x16xf32> to vector<16xf32>
    %292 = vector.shape_cast %291 : vector<16xf32> to vector<16x1xf32>
    %293 = vector.broadcast %292 : vector<16x1xf32> to vector<16x16xf32>
    %294 = arith.subf %290, %293 : vector<16x16xf32>
    %295 = math.exp %294 : vector<16x16xf32>
    %cst_108 = arith.constant dense<0.000000e+00> : vector<16xf32>
    %296 = vector.multi_reduction <add>, %295, %cst_108 [1] : vector<16x16xf32> to vector<16xf32>
    %297 = vector.shape_cast %296 : vector<16xf32> to vector<16x1xf32>
    %298 = tpu.reciprocal %297 {approx = true} : vector<16x1xf32> -> vector<16x1xf32>
    %299 = vector.broadcast %298 : vector<16x1xf32> to vector<16x16xf32>
    %300 = arith.mulf %295, %299 : vector<16x16xf32>
    %cst_109 = arith.constant dense<0.000000e+00> : vector<16x8xf32>
    %301 = tpu.matmul %300, %288, %cst_109 {dimension_numbers = #tpu.dot_dimension_numbers<[1], [0], [0], [1], [0, 0, 1, 1], [], []>} : vector<16x16xf32>, vector<16x8xf32>, vector<16x8xf32> -> vector<16x8xf32>
    %302 = arith.truncf %301 : vector<16x8xf32> to vector<16x8xbf16>
    %303 = vector.extract_strided_slice %196 {offsets = [24, 0], sizes = [8, 32], strides = [1, 1]} : vector<32x32xbf16> to vector<8x32xbf16>
    %cst_110 = arith.constant dense<0.000000e+00> : vector<16x32xf32>
    %304 = tpu.matmul %302, %303, %cst_110 {dimension_numbers = #tpu.dot_dimension_numbers<[1], [0], [0], [1], [0, 0, 1, 1], [], []>} : vector<16x8xbf16>, vector<8x32xbf16>, vector<16x32xf32> -> vector<16x32xf32>
    %305 = arith.addf %285, %304 : vector<16x32xf32>
    %306 = vector.broadcast %185 : vector<1x32xf32> to vector<16x32xf32>
    %307 = arith.addf %305, %306 : vector<16x32xf32>
    %308 = vector.broadcast %186 : vector<1x32xf32> to vector<16x32xf32>
    %309 = arith.mulf %307, %308 : vector<16x32xf32>
    %310 = arith.addf %180, %309 : vector<16x32xf32>
    %cst_111 = arith.constant dense<0.000000e+00> : vector<16xf32>
    %311 = vector.multi_reduction <add>, %310, %cst_111 [1] : vector<16x32xf32> to vector<16xf32>
    %312 = vector.shape_cast %311 : vector<16xf32> to vector<16x1xf32>
    %cst_112 = arith.constant 3.200000e+01 : f32
    %313 = vector.broadcast %cst_112 : f32 to vector<16x1xf32>
    %314 = arith.divf %312, %313 : vector<16x1xf32>
    %315 = vector.broadcast %314 : vector<16x1xf32> to vector<16x32xf32>
    %316 = arith.subf %310, %315 : vector<16x32xf32>
    %317 = arith.mulf %316, %316 : vector<16x32xf32>
    %cst_113 = arith.constant dense<0.000000e+00> : vector<16xf32>
    %318 = vector.multi_reduction <add>, %317, %cst_113 [1] : vector<16x32xf32> to vector<16xf32>
    %319 = vector.shape_cast %318 : vector<16xf32> to vector<16x1xf32>
    %cst_114 = arith.constant 3.200000e+01 : f32
    %320 = vector.broadcast %cst_114 : f32 to vector<16x1xf32>
    %321 = arith.divf %319, %320 : vector<16x1xf32>
    %cst_115 = arith.constant 9.99999997E-7 : f32
    %322 = vector.broadcast %cst_115 : f32 to vector<16x1xf32>
    %323 = arith.addf %321, %322 : vector<16x1xf32>
    %324 = math.rsqrt %323 : vector<16x1xf32>
    %325 = vector.broadcast %324 : vector<16x1xf32> to vector<16x32xf32>
    %326 = arith.mulf %316, %325 : vector<16x32xf32>
    %327 = vector.broadcast %187 : vector<1x32xf32> to vector<16x32xf32>
    %328 = arith.mulf %326, %327 : vector<16x32xf32>
    %329 = vector.broadcast %188 : vector<1x32xf32> to vector<16x32xf32>
    %330 = arith.addf %328, %329 : vector<16x32xf32>
    %331 = arith.truncf %330 : vector<16x32xf32> to vector<16x32xbf16>
    %cst_116 = arith.constant dense<0.000000e+00> : vector<16x128xf32>
    %332 = tpu.matmul %331, %198, %cst_116 {dimension_numbers = #tpu.dot_dimension_numbers<[1], [0], [0], [1], [0, 0, 1, 1], [], []>} : vector<16x32xbf16>, vector<32x128xbf16>, vector<16x128xf32> -> vector<16x128xf32>
    %333 = vector.broadcast %200 : vector<1x128xf32> to vector<16x128xf32>
    %334 = arith.addf %332, %333 : vector<16x128xf32>
    %cst_117 = arith.constant 5.000000e-01 : f32
    %335 = vector.broadcast %cst_117 : f32 to vector<16x128xf32>
    %336 = arith.mulf %335, %334 : vector<16x128xf32>
    %cst_118 = arith.constant 4.471500e-02 : f32
    %337 = vector.broadcast %cst_118 : f32 to vector<16x128xf32>
    %338 = arith.mulf %337, %334 : vector<16x128xf32>
    %339 = arith.mulf %338, %334 : vector<16x128xf32>
    %340 = arith.mulf %339, %334 : vector<16x128xf32>
    %341 = arith.addf %334, %340 : vector<16x128xf32>
    %cst_119 = arith.constant 0.797884583 : f32
    %342 = vector.broadcast %cst_119 : f32 to vector<16x128xf32>
    %343 = arith.mulf %342, %341 : vector<16x128xf32>
    %344 = math.tanh %343 : vector<16x128xf32>
    %cst_120 = arith.constant 1.000000e+00 : f32
    %345 = vector.broadcast %cst_120 : f32 to vector<16x128xf32>
    %346 = arith.addf %345, %344 : vector<16x128xf32>
    %347 = arith.mulf %336, %346 : vector<16x128xf32>
    %348 = arith.truncf %347 : vector<16x128xf32> to vector<16x128xbf16>
    %cst_121 = arith.constant dense<0.000000e+00> : vector<16x32xf32>
    %349 = tpu.matmul %348, %202, %cst_121 {dimension_numbers = #tpu.dot_dimension_numbers<[1], [0], [0], [1], [0, 0, 1, 1], [], []>} : vector<16x128xbf16>, vector<128x32xbf16>, vector<16x32xf32> -> vector<16x32xf32>
    %350 = vector.broadcast %189 : vector<1x32xf32> to vector<16x32xf32>
    %351 = arith.addf %349, %350 : vector<16x32xf32>
    %352 = vector.broadcast %190 : vector<1x32xf32> to vector<16x32xf32>
    %353 = arith.mulf %351, %352 : vector<16x32xf32>
    %354 = arith.addf %310, %353 : vector<16x32xf32>
    %c0_122 = arith.constant 0 : index
    %c0_123 = arith.constant 0 : index
    %355 = vector.load %arg12[%c0_122, %c0_123] : memref<2x32xf32, #tpu.memory_space<vmem>>, vector<2x32xf32>
    %356 = vector.extract_strided_slice %355 {offsets = [0, 0], sizes = [1, 32], strides = [1, 1]} : vector<2x32xf32> to vector<1x32xf32>
    %357 = vector.extract_strided_slice %355 {offsets = [1, 0], sizes = [1, 32], strides = [1, 1]} : vector<2x32xf32> to vector<1x32xf32>
    %cst_124 = arith.constant dense<0.000000e+00> : vector<16xf32>
    %358 = vector.multi_reduction <add>, %354, %cst_124 [1] : vector<16x32xf32> to vector<16xf32>
    %359 = vector.shape_cast %358 : vector<16xf32> to vector<16x1xf32>
    %cst_125 = arith.constant 3.200000e+01 : f32
    %360 = vector.broadcast %cst_125 : f32 to vector<16x1xf32>
    %361 = arith.divf %359, %360 : vector<16x1xf32>
    %362 = vector.broadcast %361 : vector<16x1xf32> to vector<16x32xf32>
    %363 = arith.subf %354, %362 : vector<16x32xf32>
    %364 = arith.mulf %363, %363 : vector<16x32xf32>
    %cst_126 = arith.constant dense<0.000000e+00> : vector<16xf32>
    %365 = vector.multi_reduction <add>, %364, %cst_126 [1] : vector<16x32xf32> to vector<16xf32>
    %366 = vector.shape_cast %365 : vector<16xf32> to vector<16x1xf32>
    %cst_127 = arith.constant 3.200000e+01 : f32
    %367 = vector.broadcast %cst_127 : f32 to vector<16x1xf32>
    %368 = arith.divf %366, %367 : vector<16x1xf32>
    %cst_128 = arith.constant 9.99999997E-7 : f32
    %369 = vector.broadcast %cst_128 : f32 to vector<16x1xf32>
    %370 = arith.addf %368, %369 : vector<16x1xf32>
    %371 = math.rsqrt %370 : vector<16x1xf32>
    %372 = vector.broadcast %371 : vector<16x1xf32> to vector<16x32xf32>
    %373 = arith.mulf %363, %372 : vector<16x32xf32>
    %374 = vector.broadcast %356 : vector<1x32xf32> to vector<16x32xf32>
    %375 = arith.mulf %373, %374 : vector<16x32xf32>
    %376 = vector.broadcast %357 : vector<1x32xf32> to vector<16x32xf32>
    %377 = arith.addf %375, %376 : vector<16x32xf32>
    %cst_129 = arith.constant 0.000000e+00 : f32
    %378 = vector.broadcast %cst_129 : f32 to vector<16x128xf32>
    %c0_130 = arith.constant 0 : index
    %c0_131 = arith.constant 0 : index
    %379 = vector.load %arg13[%c0_130, %c0_131] : memref<16x128xf32, #tpu.memory_space<vmem>>, vector<16x128xf32>
    tpu.vector_store %arg13[%c0_130, %c0_131], %378 {strides = array<i32>} : memref<16x128xf32, #tpu.memory_space<vmem>>, vector<16x128xf32>,
    %c0_132 = arith.constant 0 : index
    %c0_133 = arith.constant 0 : index
    %380 = vector.load %arg13[%c0_132, %c0_133] : memref<16x128xf32, #tpu.memory_space<vmem>>, vector<16x32xf32>
    tpu.vector_store %arg13[%c0_132, %c0_133], %377 {strides = array<i32>} : memref<16x128xf32, #tpu.memory_space<vmem>>, vector<16x32xf32>,
    return
  }
  func.func @transform_0(%arg0: i32) -> (i32, i32) {
    %c0_i32 = arith.constant 0 : i32
    %c0_i32_0 = arith.constant 0 : i32
    return %arg0, %c0_i32 : i32, i32
  }
  func.func @transform_1(%arg0: i32) -> (i32, i32) {
    %c0_i32 = arith.constant 0 : i32
    %c0_i32_0 = arith.constant 0 : i32
    %c0_i32_1 = arith.constant 0 : i32
    return %c0_i32, %c0_i32_0 : i32, i32
  }
  func.func @transform_2(%arg0: i32) -> (i32, i32) {
    %c0_i32 = arith.constant 0 : i32
    %c0_i32_0 = arith.constant 0 : i32
    %c0_i32_1 = arith.constant 0 : i32
    return %c0_i32, %c0_i32_0 : i32, i32
  }
  func.func @transform_3(%arg0: i32) -> (i32, i32) {
    %c0_i32 = arith.constant 0 : i32
    %c0_i32_0 = arith.constant 0 : i32
    %c0_i32_1 = arith.constant 0 : i32
    return %c0_i32, %c0_i32_0 : i32, i32
  }
  func.func @transform_4(%arg0: i32) -> (i32, i32, i32) {
    %c0_i32 = arith.constant 0 : i32
    %c0_i32_0 = arith.constant 0 : i32
    %c0_i32_1 = arith.constant 0 : i32
    %c0_i32_2 = arith.constant 0 : i32
    return %c0_i32, %c0_i32_0, %c0_i32_1 : i32, i32, i32
  }
  func.func @transform_5(%arg0: i32) -> (i32, i32, i32) {
    %c0_i32 = arith.constant 0 : i32
    %c0_i32_0 = arith.constant 0 : i32
    %c0_i32_1 = arith.constant 0 : i32
    %c0_i32_2 = arith.constant 0 : i32
    return %c0_i32, %c0_i32_0, %c0_i32_1 : i32, i32, i32
  }
  func.func @transform_6(%arg0: i32) -> (i32, i32, i32) {
    %c0_i32 = arith.constant 0 : i32
    %c0_i32_0 = arith.constant 0 : i32
    %c0_i32_1 = arith.constant 0 : i32
    %c0_i32_2 = arith.constant 0 : i32
    return %c0_i32, %c0_i32_0, %c0_i32_1 : i32, i32, i32
  }
  func.func @transform_7(%arg0: i32) -> (i32, i32, i32) {
    %c0_i32 = arith.constant 0 : i32
    %c0_i32_0 = arith.constant 0 : i32
    %c0_i32_1 = arith.constant 0 : i32
    %c0_i32_2 = arith.constant 0 : i32
    return %c0_i32, %c0_i32_0, %c0_i32_1 : i32, i32, i32
  }
  func.func @transform_8(%arg0: i32) -> (i32, i32, i32) {
    %c0_i32 = arith.constant 0 : i32
    %c0_i32_0 = arith.constant 0 : i32
    %c0_i32_1 = arith.constant 0 : i32
    %c0_i32_2 = arith.constant 0 : i32
    return %c0_i32, %c0_i32_0, %c0_i32_1 : i32, i32, i32
  }
  func.func @transform_9(%arg0: i32) -> (i32, i32, i32) {
    %c0_i32 = arith.constant 0 : i32
    %c0_i32_0 = arith.constant 0 : i32
    %c0_i32_1 = arith.constant 0 : i32
    %c0_i32_2 = arith.constant 0 : i32
    return %c0_i32, %c0_i32_0, %c0_i32_1 : i32, i32, i32
  }
  func.func @transform_10(%arg0: i32) -> (i32, i32, i32) {
    %c0_i32 = arith.constant 0 : i32
    %c0_i32_0 = arith.constant 0 : i32
    %c0_i32_1 = arith.constant 0 : i32
    %c0_i32_2 = arith.constant 0 : i32
    return %c0_i32, %c0_i32_0, %c0_i32_1 : i32, i32, i32
  }
  func.func @transform_11(%arg0: i32) -> (i32, i32) {
    %c0_i32 = arith.constant 0 : i32
    %c0_i32_0 = arith.constant 0 : i32
    %c0_i32_1 = arith.constant 0 : i32
    return %c0_i32, %c0_i32_0 : i32, i32
  }
  func.func @transform_12(%arg0: i32) -> (i32, i32) {
    %c0_i32 = arith.constant 0 : i32
    %c0_i32_0 = arith.constant 0 : i32
    return %arg0, %c0_i32 : i32, i32
  }
}

</mosaic_0001>

<bundles_post_ra>
// kernel: dinov2_encoder.1
= control target key start
LH: loop header
LB: loop body
LE: loop exit
PB: predicated region body
PF: predicated region fallthrough
CT: control target
= control target key end

     0   :  { %s4292_s21 = smov 0   ;;  %s4922_s0 = inlined_call_operand.vmem [shape: f32[32,192], index: 0, kind: input, shape index: {}]   ;;  %s4923_s1 = inlined_call_operand.vmem [shape: bf16[192,32], index: 1, kind: input, shape index: {}]   ;;  %s4924_s2 = inlined_call_operand.vmem [shape: f32[16,32], index: 2, kind: input, shape index: {}]   ;;  %s4925_s3 = inlined_call_operand.vmem [shape: f32[16,16], index: 3, kind: input, shape index: {}]   ;;  %s4926_s4 = inlined_call_operand.vmem [shape: bf16[2,32,96], index: 4, kind: input, shape index: {}]   ;;  %s4927_s5 = inlined_call_operand.vmem [shape: f32[2,1,96], index: 5, kind: input, shape index: {}]   ;;  %s4928_s6 = inlined_call_operand.vmem [shape: bf16[2,32,32], index: 6, kind: input, shape index: {}]   ;;  %s4929_s7 = inlined_call_operand.vmem [shape: bf16[2,32,128], index: 7, kind: input, shape index: {}]   ;;  %s4930_s8 = inlined_call_operand.vmem [shape: f32[2,1,128], index: 8, kind: input, shape index: {}]   ;;  %s4931_s9 = inlined_call_operand.vmem [shape: bf16[2,128,32], index: 9, kind: input, shape index: {}]   ;;  %s4932_s10 = inlined_call_operand.vmem [shape: f32[2,8,32], index: 10, kind: input, shape index: {}]   ;;  %s4933_s11 = inlined_call_operand.vmem [shape: f32[2,32], index: 11, kind: input, shape index: {}]   ;;  %s4934_s12 = inlined_call_operand.vmem [shape: f32[32,128], index: 12, kind: output, shape index: {}]  }
   0x1 LB: > { %s3405_s22 = sadd.s32 4294967295, %s4211_s21   ;;  %p3409_p0 = scmp.ge.s32.totalorder %s4211_s21, 1  ;;  %s4211_s21 = sphi %s4292_s21, %s22_s21  }
   0x2   : > { %p364_p1 = scmp.lt.s32.totalorder %s4211_s21, 3 }
   0x4   : > { %p365_p2 = pnand %p3409_p0, %p364_p1 }
   0x5   : > { %v4074_v0 = vld [vmem:[%s4923_s1] sm:$0xff] (!%p365_p2)   ;;  %v4213_v1 = vmov (!%p365_p2), 0   ;;  %s3410_s25 = sshll.u32 (!%p365_p2), %s3405_s22, 1  ;;  %v4075_v2 = vld [vmem:[%s4923_s1 + $0x8] sm:$0xff] (!%p365_p2)   ;;  %v4076_v3 = vld [vmem:[%s4923_s1 + $0x10] sm:$0xff] (!%p365_p2)   ;;  %v4214_v4 = vmov (!%p365_p2), 0.0   ;;  %v631_v45 = vlaneseq (!%p365_p2) }
   0x6   : > { %368 = sbr.rel (%p365_p2) target bundleno = 9103 (0x238f), region = 68  ;;  %529 = vmatprep.subr.bf16.mxu0 (!%p365_p2), %v4213_v1  ;;  %p408_p3 = scmp.lt.s32.totalorder (!%p365_p2), %s3410_s25, 3  ;;  %v4077_v5 = vld [vmem:[%s4923_s1 + $0x18] sm:$0xff] (!%p365_p2)   ;;  %vm525_vm0 = vcmask (!%p365_p2), 523264   ;;  %v4078_v8 = vld [vmem:[%s4923_s1 + $0x20] sm:$0xff] (!%p365_p2)   ;;  %v4079_v10 = vld [vmem:[%s4923_s1 + $0x28] sm:$0xff] (!%p365_p2)  }
   0x7   : > { %530 = vmatpush1.bf16.msra.mxu0 (!%p365_p2), %v4074_v0  ;;  %v4080_v11 = vld [vmem:[%s4923_s1 + $0x30] sm:$0xff] (!%p365_p2)   ;;  %v4081_v12 = vld [vmem:[%s4923_s1 + $0x38] sm:$0xff] (!%p365_p2)   ;;  %v4082_v13 = vld [vmem:[%s4923_s1 + $0x40] sm:$0xff] (!%p365_p2)   ;;  %vm603_vm1 = vcmask (!%p365_p2), 261120   ;;  %vm4215_vm2 = vmmov (!%p365_p2), 0   ;;  %v4382_v49 = vshrl.u32 (!%p365_p2), %v631_v45, 7 }
   0x8   : > { %531 = vmatprep.subr.bf16.mxu0 (!%p365_p2), %v4213_v1  ;;  %v4083_v14 = vld [vmem:[%s4923_s1 + $0x48] sm:$0xff] (!%p365_p2)   ;;  %v4084_v15 = vld [vmem:[%s4923_s1 + $0x50] sm:$0xff] (!%p365_p2)   ;;  %v4085_v16 = vld [vmem:[%s4923_s1 + $0x58] sm:$0xff] (!%p365_p2)   ;;  %vm712_vm3 = vcmask (!%p365_p2), 64512   ;;  %s4216_s18 = smov (!%p365_p2), 96   ;;  %s4217_s20 = smov (!%p365_p2), 88  }
   0x9   : > { %v451_v20 = vld [vmem:[%s4924_s2] sm:$0xff] (!%p365_p2)  ;;  %v452_v22 = vld [vmem:[%s4924_s2 + $0x8] sm:$0xff] (!%p365_p2)  ;;  %v4385_v50 = vsub.s32 (!%p365_p2), 0, %v4382_v49  ;;  %v4395_v55 = vsub.s32 (!%p365_p2), 1, %v4382_v49  ;;  %s4218_s22 = smov (!%p365_p2), 120   ;;  %vm4423_vm4 = vmpackc.low (!%p365_p2), %vm712_vm3, %vm712_vm3  ;;  %vm796_vm5 = vcmask (!%p365_p2), 130048  }
   0xa   : > { %v4086_v40 = vld [vmem:[%s4926_s4] sm:$0xff] (!%p365_p2)   ;;  %v4087_v41 = vld [vmem:[%s4926_s4 + $0x8] sm:$0xff] (!%p365_p2)   ;;  %s4219_s27 = smov (!%p365_p2), 64   ;;  %s4221_s28 = smov (!%p365_p2), 112   ;;  %vm1111_vm6 = vcmask (!%p365_p2), 1043456  }
   0xb   : > { %532 = vmatpush1.bf16.msra.mxu0 (!%p365_p2), %v4075_v2  ;;  %v4390_v51 = vld [vmem:[%s4932_s10] sm:$0xff] (!%p365_p2)  ;;  %s4222_s29 = smov (!%p365_p2), 80   ;;  %s4223_s17 = smov (!%p365_p2), 48  }
   0xc   : > { %533 = vmatprep.subr.bf16.mxu0 (!%p365_p2), %v4213_v1  ;;  %v634_v53 = vrot.slane (!%p365_p2), %v4390_v51, %v4385_v50  ;;  %v640_v59 = vrot.slane (!%p365_p2), %v4390_v51, %v4395_v55  ;;  %v3428_v0 = vld [vmem:[%s4927_s5] ss:$0 sm:$0xff] (!%p365_p2)  ;;  %s4937_s23 = smov (!%p365_p2), 104   ;;  %s4936_s24 = smov (!%p365_p2), 72  }
   0xd   : > { %s4945_s25 = smov (!%p408_p3, %s3410_s25), 3  ;;  %s4941_s26 = smov 104  }
   0xe   : > { %s3549_s30 = sshll.u32 %s4945_s25, 4  ;;  %s3414_s13 = sshll.u32 %s4945_s25, 3 }
   0xf   : > { %s4312_s16 = scalar_lea.vmem %s4934_s12, %s3414_s13  ;;  %s4317_s19 = scalar_lea.vmem %s4922_s0, %s3549_s30  ;;  %534 = vmatpush1.bf16.msra.mxu0 %v4076_v3 }
  0x10   : > { %3345 = vst [vmem:[%s4312_s16] sm:$0xff] %v4214_v4  ;;  %3346 = vst [vmem:[%s4312_s16 + $0x8] sm:$0xff] %v4214_v4  ;;  %535 = vmatprep.subr.bf16.mxu0 %v4213_v1  ;;  %v422_v6 = vld [vmem:[%s4317_s19 + $0x8] sm:$0xff]  ;;  %v424_v7 = vld [vmem:[%s4317_s19 + $0x18] sm:$0xff]  ;;  %s4935_s30 = smov 40   ;;  %s4943_s14 = smov 40  }
  0x11   : > { %v426_v9 = vpack.c.bf16 %v424_v7, %v422_v6  ;;  %v421_v17 = vld [vmem:[%s4317_s19] sm:$0xff]  ;;  %v423_v18 = vld [vmem:[%s4317_s19 + $0x10] sm:$0xff]  ;;  %s4220_s19 = smov 56  }
  0x12   : > { %v425_v19 = vpack.c.bf16 %v423_v18, %v421_v17 }
  0x13   : > { %536 = vmatpush1.bf16.msra.mxu0 %v4077_v5  ;;  %3427 = vmatprep.mubr.msk.bf16.mxu0 %vm525_vm0, %v426_v9 }
  0x14   : > { %537 = vmatprep.subr.bf16.mxu0 %v4213_v1 }
  0x17   : > { %538 = vmatpush1.bf16.msra.mxu0 %v4078_v8 }
  0x18   : > { %539 = vmatprep.subr.bf16.mxu0 %v4213_v1 }
  0x1b   : > { %540 = vmatpush1.bf16.msra.mxu0 %v4079_v10 }
  0x1c   : > { %541 = vmatprep.subr.bf16.mxu0 %v4213_v1 }
  0x1f   : > { %542 = vmatpush1.bf16.msra.mxu0 %v4080_v11 }
  0x20   : > { %543 = vmatprep.subr.bf16.mxu0 %v4213_v1 }
  0x23   : > { %544 = vmatpush1.bf16.msra.mxu0 %v4081_v12 }
  0x24   : > { %545 = vmatprep.subr.bf16.mxu0 %v4213_v1 }
  0x27   : > { %546 = vmatpush1.bf16.msra.mxu0 %v4082_v13 }
  0x28   : > { %547 = vmatprep.subr.bf16.mxu0 %v4213_v1 }
  0x2b   : > { %548 = vmatpush1.bf16.msra.mxu0 %v4083_v14  ;;  %v4436_v14 = vld [vmem:[%s4925_s3] sm:$0xff] }
  0x2c   : > { %549 = vmatprep.subr.bf16.mxu0 %v4213_v1 }
  0x2f   : > { %550 = vmatpush1.bf16.msra.mxu0 %v4084_v15 }
  0x30   : > { %551 = vmatprep.subr.bf16.mxu0 %v4213_v1 }
  0x33   : > { %552 = vmatpush1.bf16.msra.mxu0 %v4085_v16  ;;  %v4441_v16 = vld [vmem:[%s4925_s3 + $0x8] sm:$0xff] }
  0x34   : > { %3660 = vmatprep.subr.bf16.mxu0 %v4214_v4 }
  0x36   : > { %562 = vmatmul.mubr.bf16.vlgmr.msra.gmra.mrb[0].mxu0 %v425_v19 }
  0x37   : > { %3661 = vmatpush3.bf16.msra.mxu0 %v4086_v40  ;;  %3664 = vmatprep.mubr.msk.bf16.mxu0 %vm4215_vm2, %v4214_v4 }
  0x38   : > { %3662 = vmatprep.subr.bf16.mxu0 %v4214_v4 }
  0x3b   : > { %3663 = vmatpush3.bf16.msra.mxu0 %v4087_v41 }
 0x109   : > { %v563_v21 = vpop.f32.mrb[0].mxu0 }
 0x10a   : > { %v4361_v23 = vadd.f32 %v563_v21, %v451_v20  ;;  %v565_v24 = vpop.f32.mrb[1].mxu0 }
 0x10b   : > { %v566_v25 = vpop.f32.mrb[2].mxu0 }
 0x10c   : > { %v4363_v26 = vadd.f32 %v566_v25, %v452_v22  ;;  %v568_v27 = vpop.f32.mrb[3].mxu0  ;;  %v604_v28 = vsel %vm603_vm1, %v4361_v23, 0.0 }
 0x10d   : > { %605 = vadd.xlane.f32.xlu0 %v604_v28 }
 0x10e   : > { %v607_v29 = vsel %vm603_vm1, %v4363_v26, 0.0 }
 0x111   : > { %608 = vadd.xlane.f32.xlu0 %v607_v29 }
 0x19a   : > { %v606_v30 = vpop.xlane.xlu0 %605 }
 0x19b   : > { %v611_v31 = vmul.f32 0.03125, %v606_v30 }
 0x19d   : > { %v613_v32 = vsub.f32 %v4361_v23, %v611_v31 }
 0x19e   : > { %v609_v33 = vpop.xlane.xlu0 %608 }
 0x19f   : > { %v612_v34 = vmul.f32 0.03125, %v609_v33  ;;  %v615_v35 = vmul.f32 %v613_v32, %v613_v32 }
 0x1a1   : > { %v614_v36 = vsub.f32 %v4363_v26, %v612_v34  ;;  %v617_v37 = vsel %vm603_vm1, %v615_v35, 0.0 }
 0x1a2   : > { %618 = vadd.xlane.f32.xlu1 %v617_v37 }
 0x1a3   : > { %v616_v38 = vmul.f32 %v614_v36, %v614_v36 }
 0x1a5   : > { %v620_v39 = vsel %vm603_vm1, %v616_v38, 0.0 }
 0x1a6   : > { %621 = vadd.xlane.f32.xlu1 %v620_v39 }
 0x22f   : > { %v619_v42 = vpop.xlane.xlu1 %618 }
 0x230   : > { %v623_v43 = vmul.f32 0.03125, %v619_v42 }
 0x232   : > { %v625_v44 = vadd.f32 1e-06, %v623_v43 }
 0x233   : > { %v622_v46 = vpop.xlane.xlu1 %621 }
 0x234   : > { %4110 = vrsqrt.f32 %v625_v44  ;;  %v624_v47 = vmul.f32 0.03125, %v622_v46 }
 0x236   : > { %v626_v48 = vadd.f32 1e-06, %v624_v47 }
 0x238   : > { %4112 = vrsqrt.f32 %v626_v48 }
 0x23e   : > { %v4111_v52 = vpop.eup %4110 }
 0x23f   : > { %v629_v54 = vmul.f32 %v4111_v52, %v613_v32 }
 0x241   : > { %v635_v57 = vmul.f32 %v634_v53, %v629_v54 }
 0x242   : > { %v4113_v56 = vpop.eup %4112 }
 0x243   : > { %v630_v58 = vmul.f32 %v4113_v56, %v614_v36  ;;  %v641_v61 = vadd.f32 %v640_v59, %v635_v57 }
 0x245   : > { %v636_v60 = vmul.f32 %v634_v53, %v630_v58 }
 0x247   : > { %v642_v62 = vadd.f32 %v640_v59, %v636_v60 }
 0x249   : > { %v643_v63 = vpack.c.bf16 %v642_v62, %v641_v61 }
 0x24b   : > { %3665 = vmatmul.mubr.msk.bf16.vlgmr.msra.gmra.mrb[4].mxu0 %vm603_vm1, %v643_v63 }
 0x31e   : > { %v699_v1 = vpop.f32.mrb[4].mxu0 }
 0x31f   : > { %v4403_v2 = vadd.f32 %v3428_v0, %v699_v1  ;;  %v3666_v3 = vpop.f32.mrb[5].mxu0 }
 0x320   : > { %v702_v5 = vpop.f32.mrb[6].mxu0 }
 0x321   : > { %v4405_v6 = vadd.f32 %v3428_v0, %v702_v5  ;;  %v3667_v7 = vpop.f32.mrb[7].mxu0  ;;  %3672 = vmatprep.mubr.msk.f32.mxu0 %vm712_vm3, %v4403_v2 }
 0x323   : > { %v4411_v8 = vpack.i.bf16 %v4405_v6, %v4403_v2 }
 0x325   : > { %3995 = vrot.lane.b32.xlu0 %v4411_v8, %s4216_s18 }
 0x329   : > { %4005 = vrot.lane.b32.xlu0 %v4411_v8, %s4217_s20 }
 0x32d   : > { %907 = vrot.lane.b32.xlu0 %v4403_v2, %s4218_s22 }
 0x331   : > { %909 = vrot.lane.b32.xlu0 %v4405_v6, %s4218_s22 }
 0x397   : > { %v3996_v9 = vpop.permute.xlu0 %3995 }
 0x398   : > { %v3998_v10 = vunpack.i.h.bf16 %v3996_v9  ;;  %v3997_v11 = vunpack.i.l.bf16 %v3996_v9 }
 0x39a   : > { %v3892_v13 = vpack.c.bf16 %v3998_v10, %v3997_v11 }
 0x39b   : > { %v4006_v36 = vpop.permute.xlu0 %4005 }
 0x39c   : > { %3894 = vmatprep.subr.msk.bf16.mxu0 %vm4423_vm4, %v3892_v13  ;;  %v4008_v38 = vunpack.i.h.bf16 %v4006_v36  ;;  %v4007_v39 = vunpack.i.l.bf16 %v4006_v36 }
 0x39d   : > { %3897 = vmatpush3.bf16.xpose.msk.msra.mxu0 %vm4423_vm4, %v3892_v13 }
 0x39e   : > { %v3902_v43 = vpack.c.bf16 %v4008_v38, %v4007_v39 }
 0x39f   : > { %v908_v48 = vpop.permute.xlu0 %907 }
 0x3a3   : > { %v910_v52 = vpop.permute.xlu0 %909 }
 0x3a4   : > { %3673 = vmatmul.mubr.msk.f32.vlgmr.msra.gmra.mrb[8].mxu0 %vm712_vm3, %v4405_v6 }
 0x477   : > { %v3674_v15 = vpop.f32.mrb[8].mxu0 }
 0x478   : > { %v787_v17 = vpop.f32.mrb[9].mxu0  ;;  %v793_v19 = vadd.f32 %v3674_v15, %v4441_v16 }
 0x479   : > { %v788_v18 = vadd.f32 %v787_v17, %v4436_v14 }
 0x47a   : > { %v800_v21 = vsel %vm796_vm5, %v793_v19, -inf }
 0x47b   : > { %v797_v20 = vsel %vm796_vm5, %v788_v18, -inf }
 0x47c   : > { %798 = vmax.xlane.f32.xlu1 %v797_v20 }
 0x480   : > { %801 = vmax.xlane.f32.xlu1 %v800_v21 }
 0x509   : > { %v799_v22 = vpop.xlane.xlu1 %798 }
 0x50a   : > { %v803_v24 = vsub.f32 %v788_v18, %v799_v22 }
 0x50c   : > { %v805_v28 = vmul.f32 1.442695, %v803_v24 }
 0x50d   : > { %v802_v25 = vpop.xlane.xlu1 %801 }
 0x50e   : > { %v804_v27 = vsub.f32 %v793_v19, %v802_v25 }
 0x510   : > { %v807_v29 = vmul.f32 1.442695, %v804_v27 }
 0x512   : > { %4114 = vpow2.f32 %v807_v29 }
 0x513   : > { %4116 = vpow2.f32 %v805_v28  ;;  %v579_v28 = vld [vmem:[%s4928_s6 + $0x4] sm:$0xf] }
 0x514   : > { %v1113_v29 = vsel %vm1111_vm6, %v579_v28, 0 }
 0x51c   : > { %v4115_v30 = vpop.eup %4114 }
 0x51d   : > { %v812_v31 = vsel %vm796_vm5, %v4115_v30, 0.0  ;;  %v4117_v32 = vpop.eup %4116 }
 0x51e   : > { %813 = vadd.xlane.f32.xlu1 %v812_v31  ;;  %v809_v33 = vsel %vm796_vm5, %v4117_v32, 0.0  ;;  %v578_v31 = vld [vmem:[%s4928_s6] sm:$0xf] }
 0x522   : > { %810 = vadd.xlane.f32.xlu1 %v809_v33 }
 0x533   : > { %4000 = vrot.lane.b32.xlu1 %v4411_v8, %s4219_s27 }
 0x5ab   : > { %v814_v34 = vpop.xlane.xlu1 %813 }
 0x5ac   : > { %4118 = vrcp.f32 %v814_v34 }
 0x5af   : > { %v811_v35 = vpop.xlane.xlu1 %810 }
 0x5b0   : > { %4120 = vrcp.f32 %v811_v35 }
 0x5b3   : > { %v4001_v37 = vpop.permute.xlu1 %4000 }
 0x5b4   : > { %v4003_v40 = vunpack.i.h.bf16 %v4001_v37  ;;  %v4002_v41 = vunpack.i.l.bf16 %v4001_v37  ;;  %v1160_v37 = vsel %vm1111_vm6, %v578_v31, 0 }
 0x5b6   : > { %v3898_v42 = vpack.c.bf16 %v4003_v40, %v4002_v41  ;;  %v4119_v44 = vpop.eup %4118 }
 0x5b7   : > { %v818_v47 = vmul.f32 %v4119_v44, %v4115_v30 }
 0x5b8   : > { %3899 = vmatprep.subr.bf16.mxu1 %v3898_v42 }
 0x5b9   : > { %3901 = vmatpush3.bf16.msra.mxu1 %v3898_v42 }
 0x5ba   : > { %v4121_v45 = vpop.eup %4120  ;;  %3904 = vmatprep.subr.msk.bf16.mxu1 %vm4423_vm4, %v3902_v43 }
 0x5bb   : > { %v817_v46 = vmul.f32 %v4121_v45, %v4117_v32 }
 0x5bd   : > { %3679 = vmatprep.mubr.msk.f32.mxu1 %vm796_vm5, %v817_v46 }
 0x5be   : > { %3680 = vmatmul.mubr.msk.f32.vlgmr.msra.gmra.mrb[0].mxu1 %vm796_vm5, %v818_v47 }
 0x5bf   : > { %3686 = vmatprep.mubr.msk.f32.mxu1 %vm712_vm3, %v908_v48 }
 0x5c2   : > { %3907 = vmatpush3.bf16.xpose.msk.msra.mxu1 %vm4423_vm4, %v3902_v43 }
 0x5c9   : > { %3687 = vmatmul.mubr.msk.f32.vlgmr.msra.gmra.mrb[2].mxu1 %vm712_vm3, %v910_v52 }
 0x691   : > { %v4459_v53 = vpop.f32.mrb[0].mxu1 }
 0x692   : > { %v4461_v54 = vpop.f32.mrb[1].mxu1 }
 0x693   : > { %v906_v56 = vpack.c.bf16 %v4459_v53, %v4461_v54 }
 0x69c   : > { %v3688_v57 = vpop.f32.mrb[2].mxu1 }
 0x69d   : > { %v995_v58 = vadd.f32 %v3688_v57, %v4441_v16  ;;  %v989_v59 = vpop.f32.mrb[3].mxu1 }
 0x69e   : > { %v990_v60 = vadd.f32 %v989_v59, %v4436_v14 }
 0x69f   : > { %v1001_v61 = vsel %vm796_vm5, %v995_v58, -inf }
 0x6a0   : > { %1002 = vmax.xlane.f32.xlu0 %v1001_v61  ;;  %v998_v62 = vsel %vm796_vm5, %v990_v60, -inf }
 0x6a1   : > { %999 = vmax.xlane.f32.xlu1 %v998_v62 }
 0x6b2   : > { %4010 = vrot.lane.b32.xlu1 %v4411_v8, %s4220_s19 }
 0x6b6   : > { %1203 = vrot.lane.b32.xlu1 %v4403_v2, %s4221_s28 }
 0x6ba   : > { %1205 = vrot.lane.b32.xlu1 %v4405_v6, %s4221_s28 }
 0x72d   : > { %v1003_v63 = vpop.xlane.xlu0 %1002 }
 0x72e   : > { %v1005_v0 = vsub.f32 %v995_v58, %v1003_v63  ;;  %v1000_v1 = vpop.xlane.xlu1 %999 }
 0x72f   : > { %v1004_v3 = vsub.f32 %v990_v60, %v1000_v1 }
 0x730   : > { %v1008_v5 = vmul.f32 1.442695, %v1005_v0 }
 0x731   : > { %v1006_v7 = vmul.f32 1.442695, %v1004_v3 }
 0x732   : > { %v4011_v9 = vpop.permute.xlu1 %4010 }
 0x733   : > { %4122 = vpow2.f32 %v1006_v7  ;;  %v4013_v10 = vunpack.i.h.bf16 %v4011_v9  ;;  %v4012_v11 = vunpack.i.l.bf16 %v4011_v9 }
 0x734   : > { %4124 = vpow2.f32 %v1008_v5 }
 0x735   : > { %v3908_v13 = vpack.c.bf16 %v4013_v10, %v4012_v11 }
 0x736   : > { %v1204_v39 = vpop.permute.xlu1 %1203 }
 0x737   : > { %3909 = vmatprep.subr.bf16.mxu1 %v3908_v13 }
 0x738   : > { %3911 = vmatpush3.bf16.msra.mxu1 %v3908_v13 }
 0x739   : > { %3696 = vmatprep.subr.bf16.mxu1 %v4214_v4 }
 0x73a   : > { %v1206_v40 = vpop.permute.xlu1 %1205 }
 0x73d   : > { %v4123_v15 = vpop.eup %4122 }
 0x73e   : > { %v1010_v17 = vsel %vm796_vm5, %v4123_v15, 0.0  ;;  %v4125_v18 = vpop.eup %4124 }
 0x73f   : > { %1011 = vadd.xlane.f32.xlu0 %v1010_v17  ;;  %v1013_v19 = vsel %vm796_vm5, %v4125_v18, 0.0 }
 0x743   : > { %1014 = vadd.xlane.f32.xlu0 %v1013_v19 }
 0x759   : > { %4015 = vrot.lane.b32.xlu0 %v4411_v8, %s4222_s29 }
 0x7cc   : > { %v1012_v20 = vpop.xlane.xlu0 %1011 }
 0x7cd   : > { %4126 = vrcp.f32 %v1012_v20 }
 0x7d0   : > { %v1015_v21 = vpop.xlane.xlu0 %1014 }
 0x7d1   : > { %4128 = vrcp.f32 %v1015_v21 }
 0x7d4   : > { %v4016_v30 = vpop.permute.xlu0 %4015 }
 0x7d5   : > { %v4018_v32 = vunpack.i.h.bf16 %v4016_v30  ;;  %v4017_v33 = vunpack.i.l.bf16 %v4016_v30  ;;  %v580_v30 = vld [vmem:[%s4928_s6 + $0x8] sm:$0xf] }
 0x7d6   : > { %v1408_v31 = vsel %vm1111_vm6, %v580_v30, 0 }
 0x7d7   : > { %v4127_v22 = vpop.eup %4126  ;;  %v3912_v38 = vpack.c.bf16 %v4018_v32, %v4017_v33 }
 0x7d8   : > { %v1018_v24 = vmul.f32 %v4127_v22, %v4123_v15 }
 0x7da   : > { %3693 = vmatprep.mubr.msk.f32.mxu1 %vm796_vm5, %v1018_v24 }
 0x7db   : > { %v4129_v25 = vpop.eup %4128 }
 0x7dc   : > { %v1019_v27 = vmul.f32 %v4129_v25, %v4125_v18 }
 0x7de   : > { %3694 = vmatmul.mubr.msk.f32.vlgmr.msra.gmra.mrb[4].mxu1 %vm796_vm5, %v1019_v27 }
 0x7df   : > { %3698 = vmatprep.mubr.msk.bf16.mxu1 %vm4215_vm2, %v4214_v4  ;;  %3697 = vmatpush3.bf16.msra.mxu1 %v1113_v29 }
 0x7e0   : > { %3702 = vmatprep.subr.bf16.mxu1 %v4214_v4 }
 0x8b1   : > { %v3695_v34 = vpop.f32.mrb[4].mxu1 }
 0x8b2   : > { %v1098_v35 = vpop.f32.mrb[5].mxu1 }
 0x8b3   : > { %v1107_v36 = vpack.c.bf16 %v3695_v34, %v1098_v35 }
 0x8b5   : > { %3699 = vmatmul.mubr.msk.bf16.vlgmr.msra.gmra.mrb[8].mxu1 %vm712_vm3, %v1107_v36 }
 0x8b6   : > { %3703 = vmatpush3.bf16.msra.mxu1 %v1160_v37  ;;  %3704 = vmatprep.mubr.msk.bf16.mxu1 %vm4215_vm2, %v4214_v4 }
 0x8b7   : > { %3914 = vmatprep.subr.msk.bf16.mxu1 %vm4423_vm4, %v3912_v38 }
 0x8bd   : > { %3705 = vmatmul.mubr.msk.bf16.vlgmr.msra.gmra.mrb[12].mxu1 %vm712_vm3, %v906_v56 }
 0x8be   : > { %3712 = vmatprep.mubr.msk.f32.mxu1 %vm712_vm3, %v1204_v39 }
 0x8bf   : > { %3917 = vmatpush3.bf16.xpose.msk.msra.mxu1 %vm4423_vm4, %v3912_v38 }
 0x8c0   : > { %3722 = vmatprep.subr.bf16.mxu1 %v4214_v4 }
 0x8c6   : > { %3713 = vmatmul.mubr.msk.f32.vlgmr.msra.gmra.mrb[6].mxu1 %vm712_vm3, %v1206_v40 }
 0x8c7   : > { %3724 = vmatprep.mubr.msk.bf16.mxu1 %vm4215_vm2, %v4214_v4  ;;  %3723 = vmatpush3.bf16.msra.mxu1 %v1408_v31 }
 0x988   : > { %v1149_v41 = vpop.f32.mrb[8].mxu1 }
 0x989   : > { %v3700_v42 = vpop.f32.mrb[9].mxu1 }
 0x98a   : > { %v1152_v43 = vpop.f32.mrb[10].mxu1 }
 0x98b   : > { %v3701_v44 = vpop.f32.mrb[11].mxu1 }
 0x990   : > { %v1196_v45 = vpop.f32.mrb[12].mxu1 }
 0x991   : > { %v4509_v46 = vadd.f32 %v1196_v45, %v1149_v41  ;;  %v3706_v47 = vpop.f32.mrb[13].mxu1 }
 0x992   : > { %v1199_v48 = vpop.f32.mrb[14].mxu1 }
 0x993   : > { %v4511_v52 = vadd.f32 %v1199_v48, %v1152_v43  ;;  %v3707_v53 = vpop.f32.mrb[15].mxu1 }
 0x999   : > { %v3714_v54 = vpop.f32.mrb[6].mxu1 }
 0x99a   : > { %v1291_v56 = vadd.f32 %v3714_v54, %v4441_v16  ;;  %v1285_v57 = vpop.f32.mrb[7].mxu1 }
 0x99b   : > { %v1286_v58 = vadd.f32 %v1285_v57, %v4436_v14 }
 0x99c   : > { %v1297_v59 = vsel %vm796_vm5, %v1291_v56, -inf }
 0x99d   : > { %1298 = vmax.xlane.f32.xlu0 %v1297_v59  ;;  %v1294_v60 = vsel %vm796_vm5, %v1286_v58, -inf }
 0x99e   : > { %1295 = vmax.xlane.f32.xlu1 %v1294_v60 }
 0x9af   : > { %4020 = vrot.lane.b32.xlu1 %v4411_v8, %s4223_s17 }
 0x9b3   : > { %1453 = vrot.lane.b32.xlu1 %v4403_v2, %s4937_s23 }
 0x9b7   : > { %1455 = vrot.lane.b32.xlu1 %v4405_v6, %s4937_s23 }
 0xa2a   : > { %v1299_v61 = vpop.xlane.xlu0 %1298 }
 0xa2b   : > { %v1301_v62 = vsub.f32 %v1291_v56, %v1299_v61  ;;  %v1296_v63 = vpop.xlane.xlu1 %1295 }
 0xa2c   : > { %v1300_v0 = vsub.f32 %v1286_v58, %v1296_v63 }
 0xa2d   : > { %v1304_v1 = vmul.f32 1.442695, %v1301_v62 }
 0xa2e   : > { %v1302_v3 = vmul.f32 1.442695, %v1300_v0 }
 0xa2f   : > { %4130 = vpow2.f32 %v1304_v1  ;;  %v4021_v5 = vpop.permute.xlu1 %4020 }
 0xa30   : > { %v4023_v7 = vunpack.i.h.bf16 %v4021_v5  ;;  %v4022_v9 = vunpack.i.l.bf16 %v4021_v5  ;;  %4132 = vpow2.f32 %v1302_v3 }
 0xa32   : > { %v3918_v10 = vpack.c.bf16 %v4023_v7, %v4022_v9 }
 0xa33   : > { %v1454_v28 = vpop.permute.xlu1 %1453 }
 0xa34   : > { %3919 = vmatprep.subr.bf16.mxu0 %v3918_v10 }
 0xa35   : > { %3921 = vmatpush3.bf16.msra.mxu0 %v3918_v10 }
 0xa37   : > { %v1456_v29 = vpop.permute.xlu1 %1455 }
 0xa39   : > { %v4131_v11 = vpop.eup %4130 }
 0xa3a   : > { %v1309_v2 = vsel %vm796_vm5, %v4131_v11, 0.0  ;;  %v4133_v13 = vpop.eup %4132 }
 0xa3b   : > { %1310 = vadd.xlane.f32.xlu0 %v1309_v2  ;;  %v1306_v6 = vsel %vm796_vm5, %v4133_v13, 0.0 }
 0xa3f   : > { %1307 = vadd.xlane.f32.xlu0 %v1306_v6 }
 0xa55   : > { %4025 = vrot.lane.b32.xlu0 %v4411_v8, %s4936_s24 }
 0xac8   : > { %v1311_v15 = vpop.xlane.xlu0 %1310 }
 0xac9   : > { %4134 = vrcp.f32 %v1311_v15  ;;  %v1705_v15 = vsub.s32 2, %v4382_v49 }
 0xacc   : > { %v1308_v17 = vpop.xlane.xlu0 %1307 }
 0xacd   : > { %4136 = vrcp.f32 %v1308_v17  ;;  %v1711_v17 = vsub.s32 3, %v4382_v49 }
 0xad0   : > { %v4026_v18 = vpop.permute.xlu0 %4025 }
 0xad1   : > { %v4028_v19 = vunpack.i.h.bf16 %v4026_v18  ;;  %v4027_v20 = vunpack.i.l.bf16 %v4026_v18  ;;  %v1706_v18 = vrot.slane %v4390_v51, %v1705_v15 }
 0xad3   : > { %v3922_v21 = vpack.c.bf16 %v4028_v19, %v4027_v20  ;;  %v4135_v22 = vpop.eup %4134 }
 0xad4   : > { %v1315_v27 = vmul.f32 %v4135_v22, %v4131_v11 }
 0xad5   : > { %3924 = vmatprep.subr.msk.bf16.mxu0 %vm4423_vm4, %v3922_v21 }
 0xad7   : > { %v4137_v24 = vpop.eup %4136 }
 0xad8   : > { %v1314_v25 = vmul.f32 %v4137_v24, %v4133_v13 }
 0xada   : > { %3719 = vmatprep.mubr.msk.f32.mxu0 %vm796_vm5, %v1314_v25 }
 0xadb   : > { %3720 = vmatmul.mubr.msk.f32.vlgmr.msra.gmra.mrb[10].mxu0 %vm796_vm5, %v1315_v27 }
 0xadc   : > { %3927 = vmatpush3.bf16.xpose.msk.msra.mxu0 %vm4423_vm4, %v3922_v21  ;;  %3732 = vmatprep.mubr.msk.f32.mxu0 %vm712_vm3, %v1454_v28  ;;  %v1712_v21 = vrot.slane %v4390_v51, %v1711_v17 }
 0xadd   : > { %3742 = vmatprep.subr.bf16.mxu0 %v4214_v4 }
 0xae3   : > { %3733 = vmatmul.mubr.msk.f32.vlgmr.msra.gmra.mrb[12].mxu0 %vm712_vm3, %v1456_v29 }
 0xae4   : > { %3744 = vmatprep.mubr.msk.bf16.mxu0 %vm4215_vm2, %v4214_v4 }
 0xbae   : > { %v3721_v32 = vpop.f32.mrb[10].mxu0 }
 0xbaf   : > { %v1394_v33 = vpop.f32.mrb[11].mxu0 }
 0xbb0   : > { %v1403_v34 = vpack.c.bf16 %v3721_v32, %v1394_v33 }
 0xbb2   : > { %3725 = vmatmul.mubr.msk.bf16.vlgmr.msra.gmra.mrb[16].mxu1 %vm712_vm3, %v1403_v34 }
 0xbb6   : > { %v3734_v35 = vpop.f32.mrb[12].mxu0 }
 0xbb7   : > { %v1541_v36 = vadd.f32 %v3734_v35, %v4441_v16  ;;  %v1535_v37 = vpop.f32.mrb[13].mxu0 }
 0xbb8   : > { %v1536_v38 = vadd.f32 %v1535_v37, %v4436_v14 }
 0xbb9   : > { %v1547_v39 = vsel %vm796_vm5, %v1541_v36, -inf }
 0xbba   : > { %1548 = vmax.xlane.f32.xlu0 %v1547_v39  ;;  %v1544_v40 = vsel %vm796_vm5, %v1536_v38, -inf }
 0xbbb   : > { %1545 = vmax.xlane.f32.xlu1 %v1544_v40 }
 0xbcc   : > { %4030 = vrot.lane.b32.xlu1 %v4411_v8, %s4935_s30 }
 0xc47   : > { %v1549_v41 = vpop.xlane.xlu0 %1548 }
 0xc48   : > { %v1551_v42 = vsub.f32 %v1541_v36, %v1549_v41  ;;  %v1546_v43 = vpop.xlane.xlu1 %1545 }
 0xc49   : > { %v1550_v44 = vsub.f32 %v1536_v38, %v1546_v43 }
 0xc4a   : > { %v1554_v45 = vmul.f32 1.442695, %v1551_v42 }
 0xc4b   : > { %v1552_v47 = vmul.f32 1.442695, %v1550_v44  ;;  %v4088_v44 = vld [vmem:[%s4929_s7] sm:$0xff]  }
 0xc4c   : > { %v4031_v48 = vpop.permute.xlu1 %4030 }
 0xc4d   : > { %4138 = vpow2.f32 %v1552_v47  ;;  %v4033_v53 = vunpack.i.h.bf16 %v4031_v48  ;;  %v4032_v54 = vunpack.i.l.bf16 %v4031_v48 }
 0xc4e   : > { %4140 = vpow2.f32 %v1554_v45  ;;  %v4089_v45 = vld [vmem:[%s4929_s7 + $0x8] sm:$0xff]  }
 0xc4f   : > { %v3928_v56 = vpack.c.bf16 %v4033_v53, %v4032_v54 }
 0xc51   : > { %3929 = vmatprep.subr.bf16.mxu1 %v3928_v56 }
 0xc52   : > { %3931 = vmatpush3.bf16.msra.mxu1 %v3928_v56 }
 0xc53   : > { %3748 = vmatprep.subr.bf16.mxu1 %v4214_v4 }
 0xc57   : > { %v4139_v57 = vpop.eup %4138 }
 0xc58   : > { %v1556_v58 = vsel %vm796_vm5, %v4139_v57, 0.0  ;;  %v4141_v8 = vpop.eup %4140 }
 0xc59   : > { %1557 = vadd.xlane.f32.xlu0 %v1556_v58  ;;  %v1559_v59 = vsel %vm796_vm5, %v4141_v8, 0.0  ;;  %v1745_v58 = vsub.s32 4, %v4382_v49 }
 0xc5d   : > { %1560 = vadd.xlane.f32.xlu0 %v1559_v59  ;;  %v1746_v59 = vrot.slane %v4390_v51, %v1745_v58 }
 0xc85   : > { %v1444_v60 = vpop.f32.mrb[16].mxu1 }
 0xc86   : > { %v1451_v61 = vadd.f32 %v1444_v60, %v4509_v46  ;;  %v3726_v62 = vpop.f32.mrb[17].mxu1  ;;  %v581_v46 = vld [vmem:[%s4928_s6 + $0xc] sm:$0xf] }
 0xc87   : > { %v1447_v63 = vpop.f32.mrb[18].mxu1 }
 0xc88   : > { %v1452_v0 = vadd.f32 %v1447_v63, %v4511_v52  ;;  %v3727_v1 = vpop.f32.mrb[19].mxu1  ;;  %v1658_v52 = vsel %vm1111_vm6, %v581_v46, 0  ;;  %v4092_v46 = vld [vmem:[%s4931_s9 + $0x10] sm:$0xff]  }
 0xc89   : > { %3743 = vmatpush3.bf16.msra.mxu0 %v1658_v52  ;;  %v4093_v52 = vld [vmem:[%s4931_s9 + $0x18] sm:$0xff]  }
 0xc8a   : > { %3756 = vmatprep.subr.bf16.mxu0 %v4214_v4 }
 0xce6   : > { %v1558_v3 = vpop.xlane.xlu0 %1557 }
 0xce7   : > { %4142 = vrcp.f32 %v1558_v3 }
 0xcea   : > { %v1561_v5 = vpop.xlane.xlu0 %1560 }
 0xceb   : > { %4144 = vrcp.f32 %v1561_v5 }
 0xcf1   : > { %v4143_v7 = vpop.eup %4142 }
 0xcf2   : > { %v1564_v9 = vmul.f32 %v4143_v7, %v4139_v57 }
 0xcf4   : > { %3739 = vmatprep.mubr.msk.f32.mxu1 %vm796_vm5, %v1564_v9 }
 0xcf5   : > { %v4145_v10 = vpop.eup %4144 }
 0xcf6   : > { %v1565_v11 = vmul.f32 %v4145_v10, %v4141_v8  ;;  %v4090_v10 = vld [vmem:[%s4931_s9] sm:$0xff]  }
 0xcf8   : > { %3740 = vmatmul.mubr.msk.f32.vlgmr.msra.gmra.mrb[20].mxu1 %vm796_vm5, %v1565_v11  ;;  %v4091_v11 = vld [vmem:[%s4931_s9 + $0x8] sm:$0xff]  }
 0xcf9   : > { %3752 = vmatprep.mubr.msk.bf16.mxu1 %vm4215_vm2, %v4214_v4  ;;  %3749 = vmatpush3.bf16.msra.mxu1 %v4088_v44 }
 0xcfa   : > { %3750 = vmatprep.subr.bf16.mxu1 %v4214_v4 }
 0xcfd   : > { %3751 = vmatpush3.bf16.msra.mxu1 %v4089_v45 }
 0xcfe   : > { %3776 = vmatprep.subr.bf16.mxu1 %v4214_v4 }
 0xdcb   : > { %v3741_v2 = vpop.f32.mrb[20].mxu1 }
 0xdcc   : > { %v1644_v13 = vpop.f32.mrb[21].mxu1 }
 0xdcd   : > { %v1653_v6 = vpack.c.bf16 %v3741_v2, %v1644_v13  ;;  %v4094_v2 = vld [vmem:[%s4931_s9 + $0x20] sm:$0xff]   ;;  %v4095_v13 = vld [vmem:[%s4931_s9 + $0x28] sm:$0xff]  }
 0xdcf   : > { %3745 = vmatmul.mubr.msk.bf16.vlgmr.msra.gmra.mrb[16].mxu0 %vm712_vm3, %v1653_v6  ;;  %v4630_v6 = vld [vmem:[%s4312_s16 + $0x8] sm:$0xff] }
 0xdd0   : > { %3772 = vmatprep.mubr.msk.bf16.mxu0 %vm4215_vm2, %v4214_v4  ;;  %3757 = vmatpush3.bf16.msra.mxu0 %v4090_v10 }
 0xdd1   : > { %3758 = vmatprep.subr.bf16.mxu0 %v4214_v4 }
 0xdd4   : > { %3759 = vmatpush3.bf16.msra.mxu0 %v4091_v11 }
 0xdd5   : > { %3760 = vmatprep.subr.bf16.mxu0 %v4214_v4 }
 0xdd8   : > { %3761 = vmatpush3.bf16.msra.mxu0 %v4092_v46 }
 0xdd9   : > { %3762 = vmatprep.subr.bf16.mxu0 %v4214_v4 }
 0xddc   : > { %3763 = vmatpush3.bf16.msra.mxu0 %v4093_v52 }
 0xddd   : > { %3764 = vmatprep.subr.bf16.mxu0 %v4214_v4 }
 0xde0   : > { %3765 = vmatpush3.bf16.msra.mxu0 %v4094_v2 }
 0xde1   : > { %3766 = vmatprep.subr.bf16.mxu0 %v4630_v6 }
 0xde4   : > { %3767 = vmatpush3.bf16.msra.mxu0 %v4095_v13 }
 0xde5   : > { %3768 = vmatprep.subr.bf16.mxu0 %v4630_v6 }
 0xea2   : > { %v1694_v19 = vpop.f32.mrb[16].mxu0 }
 0xea3   : > { %v1701_v20 = vadd.f32 %v1694_v19, %v1451_v61  ;;  %v3746_v22 = vpop.f32.mrb[17].mxu0  ;;  %v1751_v61 = vsub.s32 5, %v4382_v49  ;;  %v3460_v19 = vld [vmem:[%s4930_s8] ss:$0 sm:$0xff] }
 0xea4   : > { %v1697_v24 = vpop.f32.mrb[18].mxu0 }
 0xea5   : > { %v1707_v25 = vadd.f32 %v1706_v18, %v1701_v20  ;;  %v1702_v27 = vadd.f32 %v1697_v24, %v1452_v0  ;;  %v3747_v28 = vpop.f32.mrb[19].mxu0  ;;  %v1752_v1 = vrot.slane %v4390_v51, %v1751_v61 }
 0xea7   : > { %v1713_v29 = vmul.f32 %v1712_v21, %v1707_v25  ;;  %v1708_v30 = vadd.f32 %v1706_v18, %v1702_v27  ;;  %v4096_v18 = vld [vmem:[%s4931_s9 + $0x30] sm:$0xff]  }
 0xea8   : > { %3769 = vmatpush3.bf16.msra.mxu0 %v4096_v18 }
 0xea9   : > { %v1714_v31 = vmul.f32 %v1712_v21, %v1708_v30  ;;  %v4575_v32 = vadd.f32 %v1713_v29, %v4361_v23  ;;  %3770 = vmatprep.subr.bf16.mxu0 %v4630_v6 }
 0xeab   : > { %v1717_v33 = vsel %vm603_vm1, %v4575_v32, 0.0  ;;  %v4580_v34 = vadd.f32 %v1714_v31, %v4363_v26 }
 0xeac   : > { %1718 = vadd.xlane.f32.xlu0 %v1717_v33 }
 0xead   : > { %v1720_v35 = vsel %vm603_vm1, %v4580_v34, 0.0 }
 0xeb0   : > { %1721 = vadd.xlane.f32.xlu0 %v1720_v35 }
 0xf39   : > { %v1719_v36 = vpop.xlane.xlu0 %1718 }
 0xf3a   : > { %v1723_v37 = vmul.f32 0.03125, %v1719_v36 }
 0xf3c   : > { %v1725_v38 = vsub.f32 %v4575_v32, %v1723_v37 }
 0xf3d   : > { %v1722_v39 = vpop.xlane.xlu0 %1721 }
 0xf3e   : > { %v1724_v40 = vmul.f32 0.03125, %v1722_v39  ;;  %v1727_v41 = vmul.f32 %v1725_v38, %v1725_v38 }
 0xf40   : > { %v1726_v23 = vsub.f32 %v4580_v34, %v1724_v40  ;;  %v1729_v42 = vsel %vm603_vm1, %v1727_v41, 0.0 }
 0xf41   : > { %1730 = vadd.xlane.f32.xlu0 %v1729_v42 }
 0xf42   : > { %v1728_v43 = vmul.f32 %v1726_v23, %v1726_v23 }
 0xf44   : > { %v1732_v26 = vsel %vm603_vm1, %v1728_v43, 0.0 }
 0xf45   : > { %1733 = vadd.xlane.f32.xlu0 %v1732_v26 }
 0xfce   : > { %v1731_v47 = vpop.xlane.xlu0 %1730 }
 0xfcf   : > { %v1735_v48 = vmul.f32 0.03125, %v1731_v47 }
 0xfd1   : > { %v1737_v53 = vadd.f32 1e-06, %v1735_v48  ;;  %v1839_v48 = vsub.s32 6, %v4382_v49 }
 0xfd2   : > { %v1734_v54 = vpop.xlane.xlu0 %1733 }
 0xfd3   : > { %4146 = vrsqrt.f32 %v1737_v53  ;;  %v1736_v56 = vmul.f32 0.03125, %v1734_v54  ;;  %v1932_v53 = vsub.s32 7, %v4382_v49  ;;  %v1840_v54 = vrot.slane %v4390_v51, %v1839_v48 }
 0xfd5   : > { %v1738_v57 = vadd.f32 1e-06, %v1736_v56  ;;  %v1933_v56 = vrot.slane %v4390_v51, %v1932_v53 }
 0xfd7   : > { %4148 = vrsqrt.f32 %v1738_v57 }
 0xfdd   : > { %v4147_v8 = vpop.eup %4146 }
 0xfde   : > { %v1741_v60 = vmul.f32 %v4147_v8, %v1725_v38 }
 0xfe0   : > { %v1747_v63 = vmul.f32 %v1746_v59, %v1741_v60 }
 0xfe1   : > { %v4149_v62 = vpop.eup %4148 }
 0xfe2   : > { %v1742_v0 = vmul.f32 %v4149_v62, %v1726_v23  ;;  %v1753_v5 = vadd.f32 %v1752_v1, %v1747_v63 }
 0xfe4   : > { %v1748_v3 = vmul.f32 %v1746_v59, %v1742_v0 }
 0xfe6   : > { %v1754_v7 = vadd.f32 %v1752_v1, %v1748_v3 }
 0xfe8   : > { %v1755_v9 = vpack.c.bf16 %v1754_v7, %v1753_v5 }
 0xfea   : > { %3753 = vmatmul.mubr.msk.bf16.vlgmr.msra.gmra.mrb[24].mxu1 %vm603_vm1, %v1755_v9 }
 0xfeb   : > { %3780 = vmatprep.mubr.msk.bf16.mxu1 %vm4215_vm2, %v4214_v4  ;;  %v4097_v4 = vld [vmem:[%s4931_s9 + $0x38] sm:$0xff]  }
 0xfec   : > { %3771 = vmatpush3.bf16.msra.mxu0 %v4097_v4  ;;  %v4098_v4 = vld [vmem:[%s4926_s4 + $0x10] sm:$0xff]  }
 0xfed   : > { %3812 = vmatprep.subr.bf16.mxu0 %v4630_v6  ;;  %3777 = vmatpush3.bf16.msra.mxu1 %v4098_v4 }
 0xfee   : > { %3778 = vmatprep.subr.bf16.mxu1 %v4630_v6 }
0x10bd   : > { %v1811_v20 = vpop.f32.mrb[24].mxu1 }
0x10be   : > { %v1812_v21 = vadd.f32 %v3460_v19, %v1811_v20  ;;  %v3754_v22 = vpop.f32.mrb[25].mxu1 }
0x10bf   : > { %v1814_v24 = vpop.f32.mrb[26].mxu1 }
0x10c0   : > { %v1820_v25 = vmul.f32 0.044715, %v1812_v21  ;;  %v1815_v27 = vadd.f32 %v3460_v19, %v1814_v24  ;;  %v3755_v28 = vpop.f32.mrb[27].mxu1  ;;  %v1818_v42 = vmul.f32 0.5, %v1812_v21  ;;  %v4099_v19 = vld [vmem:[%s4926_s4 + $0x18] sm:$0xff]  }
0x10c1   : > { %3779 = vmatpush3.bf16.msra.mxu1 %v4099_v19  ;;  %v4679_v28 = vld [vmem:[%s4932_s10 + $0x8] sm:$0xff] }
0x10c2   : > { %v1822_v29 = vmul.f32 %v1820_v25, %v1812_v21  ;;  %v1821_v30 = vmul.f32 0.044715, %v1815_v27  ;;  %v1819_v43 = vmul.f32 0.5, %v1815_v27 }
0x10c4   : > { %v1824_v31 = vmul.f32 %v1822_v29, %v1812_v21  ;;  %v1823_v33 = vmul.f32 %v1821_v30, %v1815_v27  ;;  %v2005_v30 = vrot.slane %v4679_v28, %v4385_v50 }
0x10c6   : > { %v1826_v35 = vadd.f32 %v1824_v31, %v1812_v21  ;;  %v1825_v36 = vmul.f32 %v1823_v33, %v1815_v27 }
0x10c8   : > { %v1828_v37 = vmul.f32 0.7978846, %v1826_v35  ;;  %v1827_v38 = vadd.f32 %v1825_v36, %v1815_v27 }
0x10ca   : > { %4150 = vtanh.f32 %v1828_v37  ;;  %v1829_v39 = vmul.f32 0.7978846, %v1827_v38  ;;  %v2011_v37 = vrot.slane %v4679_v28, %v4395_v55 }
0x10cc   : > { %4152 = vtanh.f32 %v1829_v39 }
0x10d4   : > { %v4151_v40 = vpop.eup %4150 }
0x10d5   : > { %v1832_v41 = vadd.f32 1.0, %v4151_v40 }
0x10d6   : > { %v4153_v23 = vpop.eup %4152 }
0x10d7   : > { %v1833_v26 = vadd.f32 1.0, %v4153_v23  ;;  %v1834_v44 = vmul.f32 %v1832_v41, %v1818_v42  ;;  %v3503_v23 = vld [vmem:[%s4927_s5 + $0x1] ss:$0 sm:$0xff] }
0x10d9   : > { %v1835_v45 = vmul.f32 %v1833_v26, %v1819_v43 }
0x10db   : > { %v1836_v47 = vpack.c.bf16 %v1835_v45, %v1834_v44 }
0x10dd   : > { %3773 = vmatmul.mubr.bf16.vlgmr.msra.gmra.mrb[20].mxu0 %v1836_v47 }
0x10de   : > { %3814 = vmatprep.mubr.msk.bf16.mxu0 %vm4215_vm2, %v4630_v6 }
0x11b0   : > { %v1923_v57 = vpop.f32.mrb[20].mxu0 }
0x11b1   : > { %v1924_v8 = vadd.f32 %v1923_v57, %v1840_v54  ;;  %v3774_v59 = vpop.f32.mrb[21].mxu0 }
0x11b2   : > { %v1926_v60 = vpop.f32.mrb[22].mxu0 }
0x11b3   : > { %v1934_v62 = vmul.f32 %v1933_v56, %v1924_v8  ;;  %v1927_v63 = vadd.f32 %v1926_v60, %v1840_v54  ;;  %v3775_v0 = vpop.f32.mrb[23].mxu0 }
0x11b5   : > { %v4656_v1 = vadd.f32 %v1934_v62, %v4575_v32  ;;  %v1935_v3 = vmul.f32 %v1933_v56, %v1927_v63 }
0x11b7   : > { %v4659_v5 = vadd.f32 %v1935_v3, %v4580_v34  ;;  %v1976_v7 = vsel %vm603_vm1, %v4656_v1, 0.0 }
0x11b8   : > { %1977 = vadd.xlane.f32.xlu1 %v1976_v7 }
0x11b9   : > { %v1979_v51 = vsel %vm603_vm1, %v4659_v5, 0.0 }
0x11ba   : > { %1980 = vadd.xlane.f32.xlu0 %v1979_v51 }
0x1245   : > { %v1978_v9 = vpop.xlane.xlu1 %1977 }
0x1246   : > { %v1982_v10 = vmul.f32 0.03125, %v1978_v9 }
0x1247   : > { %v1981_v11 = vpop.xlane.xlu0 %1980 }
0x1248   : > { %v1984_v46 = vsub.f32 %v4656_v1, %v1982_v10  ;;  %v1983_v52 = vmul.f32 0.03125, %v1981_v11 }
0x124a   : > { %v1985_v32 = vsub.f32 %v4659_v5, %v1983_v52  ;;  %v1986_v2 = vmul.f32 %v1984_v46, %v1984_v46 }
0x124c   : > { %v1988_v34 = vsel %vm603_vm1, %v1986_v2, 0.0  ;;  %v1987_v13 = vmul.f32 %v1985_v32, %v1985_v32 }
0x124d   : > { %1989 = vadd.xlane.f32.xlu0 %v1988_v34 }
0x124e   : > { %v1991_v18 = vsel %vm603_vm1, %v1987_v13, 0.0 }
0x1251   : > { %1992 = vadd.xlane.f32.xlu0 %v1991_v18 }
0x12da   : > { %v1990_v20 = vpop.xlane.xlu0 %1989 }
0x12db   : > { %v1994_v21 = vmul.f32 0.03125, %v1990_v20 }
0x12dd   : > { %v1996_v22 = vadd.f32 1e-06, %v1994_v21 }
0x12de   : > { %v1993_v24 = vpop.xlane.xlu0 %1992 }
0x12df   : > { %4154 = vrsqrt.f32 %v1996_v22  ;;  %v1995_v25 = vmul.f32 0.03125, %v1993_v24 }
0x12e1   : > { %v1997_v27 = vadd.f32 1e-06, %v1995_v25 }
0x12e3   : > { %4156 = vrsqrt.f32 %v1997_v27 }
0x12e9   : > { %v4155_v29 = vpop.eup %4154 }
0x12ea   : > { %v2000_v31 = vmul.f32 %v4155_v29, %v1984_v46 }
0x12ec   : > { %v2006_v35 = vmul.f32 %v2005_v30, %v2000_v31 }
0x12ed   : > { %v4157_v33 = vpop.eup %4156 }
0x12ee   : > { %v2001_v36 = vmul.f32 %v4157_v33, %v1985_v32  ;;  %v2012_v39 = vadd.f32 %v2011_v37, %v2006_v35 }
0x12f0   : > { %v2007_v38 = vmul.f32 %v2005_v30, %v2001_v36 }
0x12f2   : > { %v2013_v40 = vadd.f32 %v2011_v37, %v2007_v38 }
0x12f4   : > { %v2014_v41 = vpack.c.bf16 %v2013_v40, %v2012_v39 }
0x12f6   : > { %3781 = vmatmul.mubr.msk.bf16.vlgmr.msra.gmra.mrb[28].mxu1 %vm603_vm1, %v2014_v41 }
0x13c9   : > { %v2070_v42 = vpop.f32.mrb[28].mxu1 }
0x13ca   : > { %v4689_v43 = vadd.f32 %v3503_v23, %v2070_v42  ;;  %v3782_v26 = vpop.f32.mrb[29].mxu1  ;;  %v4733_v42 = vld [vmem:[%s4925_s3] sm:$0xff] }
0x13cb   : > { %v2073_v44 = vpop.f32.mrb[30].mxu1 }
0x13cc   : > { %v4691_v45 = vadd.f32 %v3503_v23, %v2073_v44  ;;  %v3783_v47 = vpop.f32.mrb[31].mxu1  ;;  %3788 = vmatprep.mubr.msk.f32.mxu1 %vm712_vm3, %v4689_v43 }
0x13ce   : > { %v4697_v54 = vpack.i.bf16 %v4691_v45, %v4689_v43 }
0x13d0   : > { %4035 = vrot.lane.b32.xlu0 %v4697_v54, %s4216_s18 }
0x1442   : > { %v4036_v56 = vpop.permute.xlu0 %4035 }
0x1443   : > { %v4038_v57 = vunpack.i.h.bf16 %v4036_v56  ;;  %v4037_v8 = vunpack.i.l.bf16 %v4036_v56  ;;  %v3479_v56 = vld [vmem:[%s4928_s6 + $0x14] sm:$0xf] }
0x1445   : > { %v3932_v59 = vpack.c.bf16 %v4038_v57, %v4037_v8 }
0x1447   : > { %3934 = vmatprep.subr.msk.bf16.mxu1 %vm4423_vm4, %v3932_v59 }
0x1448   : > { %3937 = vmatpush3.bf16.xpose.msk.msra.mxu1 %vm4423_vm4, %v3932_v59 }
0x144f   : > { %3789 = vmatmul.mubr.msk.f32.vlgmr.msra.gmra.mrb[22].mxu1 %vm712_vm3, %v4691_v45 }
0x1522   : > { %v3790_v60 = vpop.f32.mrb[22].mxu1 }
0x1523   : > { %v2163_v62 = vadd.f32 %v3790_v60, %v4441_v16  ;;  %v2157_v63 = vpop.f32.mrb[23].mxu1 }
0x1524   : > { %v2158_v0 = vadd.f32 %v2157_v63, %v4436_v14 }
0x1525   : > { %v2169_v3 = vsel %vm796_vm5, %v2163_v62, -inf }
0x1526   : > { %2170 = vmax.xlane.f32.xlu0 %v2169_v3  ;;  %v2166_v7 = vsel %vm796_vm5, %v2158_v0, -inf }
0x1527   : > { %2167 = vmax.xlane.f32.xlu1 %v2166_v7 }
0x1538   : > { %4040 = vrot.lane.b32.xlu1 %v4697_v54, %s4219_s27 }
0x153c   : > { %2276 = vrot.lane.b32.xlu0 %v4689_v43, %s4218_s22  ;;  %4045 = vrot.lane.b32.xlu1 %v4697_v54, %s4217_s20 }
0x15b3   : > { %v2171_v51 = vpop.xlane.xlu0 %2170 }
0x15b4   : > { %v2173_v9 = vsub.f32 %v2163_v62, %v2171_v51  ;;  %v2168_v10 = vpop.xlane.xlu1 %2167 }
0x15b5   : > { %v2172_v11 = vsub.f32 %v2158_v0, %v2168_v10 }
0x15b6   : > { %v2176_v14 = vmul.f32 1.442695, %v2173_v9 }
0x15b7   : > { %v2174_v46 = vmul.f32 1.442695, %v2172_v11  ;;  %v2277_v35 = vpop.permute.xlu0 %2276 }
0x15b8   : > { %4158 = vpow2.f32 %v2176_v14  ;;  %v4041_v52 = vpop.permute.xlu1 %4040 }
0x15b9   : > { %v4043_v32 = vunpack.i.h.bf16 %v4041_v52  ;;  %v4042_v2 = vunpack.i.l.bf16 %v4041_v52  ;;  %4160 = vpow2.f32 %v2174_v46 }
0x15bb   : > { %v3938_v34 = vpack.c.bf16 %v4043_v32, %v4042_v2 }
0x15bc   : > { %v4046_v13 = vpop.permute.xlu1 %4045 }
0x15bd   : > { %v4048_v18 = vunpack.i.h.bf16 %v4046_v13  ;;  %v4047_v4 = vunpack.i.l.bf16 %v4046_v13  ;;  %3939 = vmatprep.subr.bf16.mxu1 %v3938_v34 }
0x15be   : > { %3941 = vmatpush3.bf16.msra.mxu1 %v3938_v34 }
0x15bf   : > { %v3942_v19 = vpack.c.bf16 %v4048_v18, %v4047_v4  ;;  %v3478_v4 = vld [vmem:[%s4928_s6 + $0x10] sm:$0xf] }
0x15c1   : > { %3944 = vmatprep.subr.msk.bf16.mxu1 %vm4423_vm4, %v3942_v19 }
0x15c2   : > { %v4159_v20 = vpop.eup %4158 }
0x15c3   : > { %v2181_v21 = vsel %vm796_vm5, %v4159_v20, 0.0  ;;  %v4161_v22 = vpop.eup %4160 }
0x15c4   : > { %2182 = vadd.xlane.f32.xlu1 %v2181_v21  ;;  %v2178_v24 = vsel %vm796_vm5, %v4161_v22, 0.0 }
0x15c8   : > { %2179 = vadd.xlane.f32.xlu1 %v2178_v24 }
0x15d9   : > { %2278 = vrot.lane.b32.xlu1 %v4691_v45, %s4218_s22 }
0x1651   : > { %v2183_v25 = vpop.xlane.xlu1 %2182 }
0x1652   : > { %4162 = vrcp.f32 %v2183_v25 }
0x1655   : > { %v2180_v27 = vpop.xlane.xlu1 %2179 }
0x1656   : > { %4164 = vrcp.f32 %v2180_v27 }
0x1659   : > { %v2279_v36 = vpop.permute.xlu1 %2278 }
0x165c   : > { %v4163_v29 = vpop.eup %4162 }
0x165d   : > { %v2187_v33 = vmul.f32 %v4163_v29, %v4159_v20 }
0x1660   : > { %v4165_v30 = vpop.eup %4164 }
0x1661   : > { %v2186_v31 = vmul.f32 %v4165_v30, %v4161_v22  ;;  %v2528_v22 = vsel %vm1111_vm6, %v3478_v4, 0 }
0x1663   : > { %3795 = vmatprep.mubr.msk.f32.mxu1 %vm796_vm5, %v2186_v31 }
0x1664   : > { %3796 = vmatmul.mubr.msk.f32.vlgmr.msra.gmra.mrb[32].mxu1 %vm796_vm5, %v2187_v33 }
0x1665   : > { %3947 = vmatpush3.bf16.xpose.msk.msra.mxu1 %vm4423_vm4, %v3942_v19  ;;  %3802 = vmatprep.mubr.msk.f32.mxu1 %vm712_vm3, %v2277_v35 }
0x166c   : > { %3803 = vmatmul.mubr.msk.f32.vlgmr.msra.gmra.mrb[34].mxu1 %vm712_vm3, %v2279_v36 }
0x1737   : > { %v3797_v37 = vpop.f32.mrb[32].mxu1 }
0x1738   : > { %v2266_v38 = vpop.f32.mrb[33].mxu1 }
0x1739   : > { %v2275_v39 = vpack.c.bf16 %v3797_v37, %v2266_v38 }
0x173f   : > { %v3804_v40 = vpop.f32.mrb[34].mxu1 }
0x1740   : > { %v2364_v41 = vadd.f32 %v3804_v40, %v4441_v16  ;;  %v2358_v23 = vpop.f32.mrb[35].mxu1  ;;  %v2481_v16 = vsel %vm1111_vm6, %v3479_v56, 0 }
0x1741   : > { %v2359_v26 = vadd.f32 %v4733_v42, %v2358_v23  ;;  %3813 = vmatpush3.bf16.msra.mxu0 %v2481_v16 }
0x1742   : > { %v2370_v44 = vsel %vm796_vm5, %v2364_v41, -inf }
0x1743   : > { %2371 = vmax.xlane.f32.xlu0 %v2370_v44  ;;  %v2367_v47 = vsel %vm796_vm5, %v2359_v26, -inf  ;;  %v4204_v44 = vld [vmem:[%s4925_s3 + $0x8] sm:$0xff] }
0x1744   : > { %2368 = vmax.xlane.f32.xlu1 %v2367_v47 }
0x1759   : > { %4055 = vrot.lane.b32.xlu0 %v4697_v54, %s4222_s29 }
0x17d0   : > { %v2372_v57 = vpop.xlane.xlu0 %2371 }
0x17d1   : > { %v2374_v8 = vsub.f32 %v2364_v41, %v2372_v57  ;;  %v2369_v59 = vpop.xlane.xlu1 %2368 }
0x17d2   : > { %v2373_v60 = vsub.f32 %v2359_v26, %v2369_v59 }
0x17d3   : > { %v2377_v62 = vmul.f32 1.442695, %v2374_v8 }
0x17d4   : > { %v2375_v63 = vmul.f32 1.442695, %v2373_v60  ;;  %v4056_v0 = vpop.permute.xlu0 %4055 }
0x17d5   : > { %4166 = vpow2.f32 %v2377_v62  ;;  %v4058_v3 = vunpack.i.h.bf16 %v4056_v0  ;;  %v4057_v7 = vunpack.i.l.bf16 %v4056_v0 }
0x17d6   : > { %4168 = vpow2.f32 %v2375_v63 }
0x17d7   : > { %v3952_v51 = vpack.c.bf16 %v4058_v3, %v4057_v7 }
0x17d9   : > { %3954 = vmatprep.subr.msk.bf16.mxu0 %vm4423_vm4, %v3952_v51 }
0x17df   : > { %v4167_v9 = vpop.eup %4166 }
0x17e0   : > { %v2382_v10 = vsel %vm796_vm5, %v4167_v9, 0.0  ;;  %v4169_v11 = vpop.eup %4168 }
0x17e1   : > { %2383 = vadd.xlane.f32.xlu1 %v2382_v10  ;;  %v2379_v14 = vsel %vm796_vm5, %v4169_v11, 0.0 }
0x17e5   : > { %2380 = vadd.xlane.f32.xlu1 %v2379_v14 }
0x17f6   : > { %4050 = vrot.lane.b32.xlu1 %v4697_v54, %s4220_s19 }
0x17fa   : > { %2571 = vrot.lane.b32.xlu1 %v4689_v43, %s4221_s28 }
0x17fe   : > { %2573 = vrot.lane.b32.xlu1 %v4691_v45, %s4221_s28 }
0x186e   : > { %v2384_v46 = vpop.xlane.xlu1 %2383 }
0x186f   : > { %4170 = vrcp.f32 %v2384_v46 }
0x1872   : > { %v2381_v52 = vpop.xlane.xlu1 %2380 }
0x1873   : > { %4172 = vrcp.f32 %v2381_v52 }
0x1876   : > { %v4051_v32 = vpop.permute.xlu1 %4050 }
0x1877   : > { %v4053_v2 = vunpack.i.h.bf16 %v4051_v32  ;;  %v4052_v34 = vunpack.i.l.bf16 %v4051_v32 }
0x1879   : > { %v3948_v13 = vpack.c.bf16 %v4053_v2, %v4052_v34  ;;  %v4171_v18 = vpop.eup %4170 }
0x187a   : > { %v2388_v21 = vmul.f32 %v4171_v18, %v4167_v9  ;;  %v2572_v29 = vpop.permute.xlu1 %2571 }
0x187b   : > { %3949 = vmatprep.subr.bf16.mxu1 %v3948_v13 }
0x187c   : > { %3951 = vmatpush3.bf16.msra.mxu1 %v3948_v13 }
0x187d   : > { %v4173_v19 = vpop.eup %4172  ;;  %3818 = vmatprep.subr.bf16.mxu1 %v4630_v6 }
0x187e   : > { %v2387_v20 = vmul.f32 %v4173_v19, %v4169_v11  ;;  %v2574_v36 = vpop.permute.xlu1 %2573 }
0x1880   : > { %3809 = vmatprep.mubr.msk.f32.mxu1 %vm796_vm5, %v2387_v20 }
0x1881   : > { %3810 = vmatmul.mubr.msk.f32.vlgmr.msra.gmra.mrb[36].mxu1 %vm796_vm5, %v2388_v21 }
0x1882   : > { %3819 = vmatpush3.bf16.msra.mxu1 %v2528_v22  ;;  %3820 = vmatprep.mubr.msk.bf16.mxu1 %vm4215_vm2, %v4630_v6 }
0x1885   : > { %3821 = vmatmul.mubr.msk.bf16.vlgmr.msra.gmra.mrb[40].mxu1 %vm712_vm3, %v2275_v39 }
0x1954   : > { %v3811_v24 = vpop.f32.mrb[36].mxu1 }
0x1955   : > { %v2467_v25 = vpop.f32.mrb[37].mxu1 }
0x1956   : > { %v2476_v27 = vpack.c.bf16 %v3811_v24, %v2467_v25  ;;  %v3480_v24 = vld [vmem:[%s4928_s6 + $0x18] sm:$0xf] }
0x1957   : > { %v2776_v25 = vsel %vm1111_vm6, %v3480_v24, 0 }
0x1958   : > { %3815 = vmatmul.mubr.msk.bf16.vlgmr.msra.gmra.mrb[24].mxu0 %vm712_vm3, %v2476_v27  ;;  %v2564_v30 = vpop.f32.mrb[40].mxu1 }
0x1959   : > { %3957 = vmatpush3.bf16.xpose.msk.msra.mxu0 %vm4423_vm4, %v3952_v51  ;;  %v3822_v31 = vpop.f32.mrb[41].mxu1  ;;  %3828 = vmatprep.mubr.msk.f32.mxu0 %vm712_vm3, %v2572_v29 }
0x195a   : > { %v2567_v33 = vpop.f32.mrb[42].mxu1  ;;  %3838 = vmatprep.subr.bf16.mxu0 %v4630_v6 }
0x195b   : > { %v3823_v35 = vpop.f32.mrb[43].mxu1 }
0x1960   : > { %3829 = vmatmul.mubr.msk.f32.vlgmr.msra.gmra.mrb[14].mxu0 %vm712_vm3, %v2574_v36 }
0x1961   : > { %3840 = vmatprep.mubr.msk.bf16.mxu0 %vm4215_vm2, %v4630_v6  ;;  %3839 = vmatpush3.bf16.msra.mxu0 %v2776_v25 }
0x1a2b   : > { %v2517_v37 = vpop.f32.mrb[24].mxu0 }
0x1a2c   : > { %v4772_v38 = vadd.f32 %v2564_v30, %v2517_v37  ;;  %v3816_v39 = vpop.f32.mrb[25].mxu0 }
0x1a2d   : > { %v2520_v40 = vpop.f32.mrb[26].mxu0 }
0x1a2e   : > { %v4774_v41 = vadd.f32 %v2567_v33, %v2520_v40  ;;  %v3817_v23 = vpop.f32.mrb[27].mxu0 }
0x1a33   : > { %v3830_v26 = vpop.f32.mrb[14].mxu0 }
0x1a34   : > { %v2659_v47 = vadd.f32 %v4204_v44, %v3830_v26  ;;  %v2653_v56 = vpop.f32.mrb[15].mxu0 }
0x1a35   : > { %v2654_v16 = vadd.f32 %v4733_v42, %v2653_v56 }
0x1a36   : > { %v2665_v57 = vsel %vm796_vm5, %v2659_v47, -inf }
0x1a37   : > { %2666 = vmax.xlane.f32.xlu0 %v2665_v57  ;;  %v2662_v8 = vsel %vm796_vm5, %v2654_v16, -inf }
0x1a38   : > { %2663 = vmax.xlane.f32.xlu1 %v2662_v8 }
0x1a49   : > { %4060 = vrot.lane.b32.xlu1 %v4697_v54, %s4223_s17  ;;  %s4942_s17 = smov 72  }
0x1a4d   : > { %2821 = vrot.lane.b32.xlu1 %v4689_v43, %s4941_s26 }
0x1a51   : > { %2823 = vrot.lane.b32.xlu1 %v4691_v45, %s4941_s26 }
0x1ac4   : > { %v2667_v59 = vpop.xlane.xlu0 %2666 }
0x1ac5   : > { %v2669_v60 = vsub.f32 %v2659_v47, %v2667_v59  ;;  %v2664_v62 = vpop.xlane.xlu1 %2663 }
0x1ac6   : > { %v2668_v63 = vsub.f32 %v2654_v16, %v2664_v62 }
0x1ac7   : > { %v2672_v0 = vmul.f32 1.442695, %v2669_v60 }
0x1ac8   : > { %v2670_v3 = vmul.f32 1.442695, %v2668_v63 }
0x1ac9   : > { %4174 = vpow2.f32 %v2672_v0  ;;  %v4061_v7 = vpop.permute.xlu1 %4060 }
0x1aca   : > { %v4063_v51 = vunpack.i.h.bf16 %v4061_v7  ;;  %v4062_v9 = vunpack.i.l.bf16 %v4061_v7  ;;  %4176 = vpow2.f32 %v2670_v3 }
0x1acc   : > { %v3958_v10 = vpack.c.bf16 %v4063_v51, %v4062_v9 }
0x1acd   : > { %v2822_v21 = vpop.permute.xlu1 %2821 }
0x1ace   : > { %3959 = vmatprep.subr.bf16.mxu1 %v3958_v10 }
0x1acf   : > { %3961 = vmatpush3.bf16.msra.mxu1 %v3958_v10 }
0x1ad1   : > { %v2824_v22 = vpop.permute.xlu1 %2823 }
0x1ad3   : > { %v4175_v11 = vpop.eup %4174 }
0x1ad4   : > { %v2677_v43 = vsel %vm796_vm5, %v4175_v11, 0.0  ;;  %v4177_v14 = vpop.eup %4176 }
0x1ad5   : > { %2678 = vadd.xlane.f32.xlu0 %v2677_v43  ;;  %v2674_v45 = vsel %vm796_vm5, %v4177_v14, 0.0 }
0x1ad9   : > { %2675 = vadd.xlane.f32.xlu0 %v2674_v45 }
0x1aef   : > { %4065 = vrot.lane.b32.xlu0 %v4697_v54, %s4942_s17 }
0x1b62   : > { %v2679_v46 = vpop.xlane.xlu0 %2678 }
0x1b63   : > { %4178 = vrcp.f32 %v2679_v46 }
0x1b66   : > { %v2676_v52 = vpop.xlane.xlu0 %2675 }
0x1b67   : > { %4180 = vrcp.f32 %v2676_v52 }
0x1b6a   : > { %v4066_v32 = vpop.permute.xlu0 %4065 }
0x1b6b   : > { %v4068_v2 = vunpack.i.h.bf16 %v4066_v32  ;;  %v4067_v34 = vunpack.i.l.bf16 %v4066_v32 }
0x1b6d   : > { %v3962_v13 = vpack.c.bf16 %v4068_v2, %v4067_v34  ;;  %v4179_v18 = vpop.eup %4178  ;;  %v3074_v2 = vrot.slane %v4679_v28, %v1705_v15 }
0x1b6e   : > { %v2683_v20 = vmul.f32 %v4179_v18, %v4175_v11  ;;  %v3080_v18 = vrot.slane %v4679_v28, %v1711_v17 }
0x1b6f   : > { %3964 = vmatprep.subr.msk.bf16.mxu1 %vm4423_vm4, %v3962_v13 }
0x1b71   : > { %v4181_v4 = vpop.eup %4180 }
0x1b72   : > { %v2682_v19 = vmul.f32 %v4181_v4, %v4177_v14 }
0x1b74   : > { %3835 = vmatprep.mubr.msk.f32.mxu1 %vm796_vm5, %v2682_v19 }
0x1b75   : > { %3836 = vmatmul.mubr.msk.f32.vlgmr.msra.gmra.mrb[38].mxu1 %vm796_vm5, %v2683_v20 }
0x1b76   : > { %3967 = vmatpush3.bf16.xpose.msk.msra.mxu1 %vm4423_vm4, %v3962_v13  ;;  %3848 = vmatprep.mubr.msk.f32.mxu1 %vm712_vm3, %v2822_v21 }
0x1b77   : > { %3858 = vmatprep.subr.bf16.mxu1 %v4630_v6 }
0x1b7d   : > { %3849 = vmatmul.mubr.msk.f32.vlgmr.msra.gmra.mrb[44].mxu1 %vm712_vm3, %v2824_v22 }
0x1b7e   : > { %3860 = vmatprep.mubr.msk.bf16.mxu1 %vm4215_vm2, %v4630_v6 }
0x1c48   : > { %v3837_v27 = vpop.f32.mrb[38].mxu1 }
0x1c49   : > { %v2762_v12 = vpop.f32.mrb[39].mxu1 }
0x1c4a   : > { %v2771_v29 = vpack.c.bf16 %v3837_v27, %v2762_v12 }
0x1c4c   : > { %3841 = vmatmul.mubr.msk.bf16.vlgmr.msra.gmra.mrb[28].mxu0 %vm712_vm3, %v2771_v29 }
0x1c50   : > { %v3850_v30 = vpop.f32.mrb[44].mxu1 }
0x1c51   : > { %v2909_v31 = vadd.f32 %v4204_v44, %v3850_v30  ;;  %v2903_v33 = vpop.f32.mrb[45].mxu1 }
0x1c52   : > { %v2904_v35 = vadd.f32 %v4733_v42, %v2903_v33 }
0x1c53   : > { %v2915_v36 = vsel %vm796_vm5, %v2909_v31, -inf }
0x1c54   : > { %2916 = vmax.xlane.f32.xlu0 %v2915_v36  ;;  %v2912_v37 = vsel %vm796_vm5, %v2904_v35, -inf }
0x1c55   : > { %2913 = vmax.xlane.f32.xlu1 %v2912_v37 }
0x1c66   : > { %4070 = vrot.lane.b32.xlu1 %v4697_v54, %s4943_s14 }
0x1ce1   : > { %v2917_v39 = vpop.xlane.xlu0 %2916 }
0x1ce2   : > { %v2919_v40 = vsub.f32 %v2909_v31, %v2917_v39  ;;  %v2914_v23 = vpop.xlane.xlu1 %2913 }
0x1ce3   : > { %v2918_v26 = vsub.f32 %v2904_v35, %v2914_v23  ;;  %v4100_v23 = vld [vmem:[%s4929_s7 + $0x10] sm:$0xff]  }
0x1ce4   : > { %v2922_v47 = vmul.f32 1.442695, %v2919_v40 }
0x1ce5   : > { %v2920_v56 = vmul.f32 1.442695, %v2918_v26  ;;  %v4101_v26 = vld [vmem:[%s4929_s7 + $0x18] sm:$0xff]  }
0x1ce6   : > { %v4071_v16 = vpop.permute.xlu1 %4070 }
0x1ce7   : > { %4182 = vpow2.f32 %v2920_v56  ;;  %v4073_v44 = vunpack.i.h.bf16 %v4071_v16  ;;  %v4072_v57 = vunpack.i.l.bf16 %v4071_v16 }
0x1ce8   : > { %4184 = vpow2.f32 %v2922_v47 }
0x1ce9   : > { %v3968_v42 = vpack.c.bf16 %v4073_v44, %v4072_v57 }
0x1ceb   : > { %3969 = vmatprep.subr.bf16.mxu0 %v3968_v42 }
0x1cec   : > { %3971 = vmatpush3.bf16.msra.mxu0 %v3968_v42 }
0x1ced   : > { %3864 = vmatprep.subr.bf16.mxu0 %v4630_v6 }
0x1cf1   : > { %v4183_v8 = vpop.eup %4182 }
0x1cf2   : > { %v2924_v59 = vsel %vm796_vm5, %v4183_v8, 0.0  ;;  %v4185_v54 = vpop.eup %4184 }
0x1cf3   : > { %2925 = vadd.xlane.f32.xlu0 %v2924_v59  ;;  %v2927_v60 = vsel %vm796_vm5, %v4185_v54, 0.0  ;;  %v3114_v59 = vrot.slane %v4679_v28, %v1745_v58  ;;  %v4103_v58 = vld [vmem:[%s4931_s9 + $0x48] sm:$0xff]  }
0x1cf7   : > { %2928 = vadd.xlane.f32.xlu0 %v2927_v60 }
0x1d1f   : > { %v2812_v62 = vpop.f32.mrb[28].mxu0 }
0x1d20   : > { %v2819_v63 = vadd.f32 %v2812_v62, %v4772_v38  ;;  %v3842_v0 = vpop.f32.mrb[29].mxu0  ;;  %v3481_v38 = vld [vmem:[%s4928_s6 + $0x1c] sm:$0xf] }
0x1d21   : > { %v2815_v3 = vpop.f32.mrb[30].mxu0  ;;  %v3120_v0 = vrot.slane %v4679_v28, %v1751_v61  ;;  %v4104_v61 = vld [vmem:[%s4931_s9 + $0x50] sm:$0xff]  }
0x1d22   : > { %v2820_v7 = vadd.f32 %v2815_v3, %v4774_v41  ;;  %v3843_v51 = vpop.f32.mrb[31].mxu0  ;;  %v3026_v41 = vsel %vm1111_vm6, %v3481_v38, 0  ;;  %v4109_v38 = vld [vmem:[%s4931_s9 + $0x78] sm:$0xff]  }
0x1d23   : > { %3859 = vmatpush3.bf16.msra.mxu1 %v3026_v41  ;;  %v3535_v41 = vld [vmem:[%s4930_s8 + $0x1] ss:$0 sm:$0xff] }
0x1d24   : > { %3872 = vmatprep.subr.bf16.mxu1 %v4630_v6 }
0x1d80   : > { %v2926_v9 = vpop.xlane.xlu0 %2925 }
0x1d81   : > { %4186 = vrcp.f32 %v2926_v9 }
0x1d84   : > { %v2929_v10 = vpop.xlane.xlu0 %2928 }
0x1d85   : > { %4188 = vrcp.f32 %v2929_v10  ;;  %v4102_v10 = vld [vmem:[%s4931_s9 + $0x40] sm:$0xff]  }
0x1d8b   : > { %v4187_v11 = vpop.eup %4186 }
0x1d8c   : > { %v2932_v43 = vmul.f32 %v4187_v11, %v4183_v8  ;;  %v4105_v11 = vld [vmem:[%s4931_s9 + $0x58] sm:$0xff]  }
0x1d8e   : > { %3855 = vmatprep.mubr.msk.f32.mxu0 %vm796_vm5, %v2932_v43  ;;  %v4106_v43 = vld [vmem:[%s4931_s9 + $0x60] sm:$0xff]  }
0x1d8f   : > { %v4189_v14 = vpop.eup %4188 }
0x1d90   : > { %v2933_v45 = vmul.f32 %v4189_v14, %v4185_v54  ;;  %v4107_v14 = vld [vmem:[%s4931_s9 + $0x68] sm:$0xff]  }
0x1d92   : > { %3856 = vmatmul.mubr.msk.f32.vlgmr.msra.gmra.mrb[32].mxu0 %vm796_vm5, %v2933_v45  ;;  %v4108_v45 = vld [vmem:[%s4931_s9 + $0x70] sm:$0xff]  }
0x1d93   : > { %3868 = vmatprep.mubr.msk.bf16.mxu0 %vm4215_vm2, %v4630_v6  ;;  %3865 = vmatpush3.bf16.msra.mxu0 %v4100_v23 }
0x1d94   : > { %3866 = vmatprep.subr.bf16.mxu0 %v4630_v6 }
0x1d97   : > { %3867 = vmatpush3.bf16.msra.mxu0 %v4101_v26 }
0x1e65   : > { %v3857_v46 = vpop.f32.mrb[32].mxu0 }
0x1e66   : > { %v3012_v52 = vpop.f32.mrb[33].mxu0 }
0x1e67   : > { %v3021_v32 = vpack.c.bf16 %v3857_v46, %v3012_v52 }
0x1e69   : > { %3861 = vmatmul.mubr.msk.bf16.vlgmr.msra.gmra.mrb[48].mxu1 %vm712_vm3, %v3021_v32 }
0x1e6a   : > { %3888 = vmatprep.mubr.msk.bf16.mxu1 %vm4215_vm2, %v4630_v6  ;;  %3873 = vmatpush3.bf16.msra.mxu1 %v4102_v10 }
0x1e6b   : > { %3874 = vmatprep.subr.bf16.mxu1 %v4630_v6 }
0x1e6e   : > { %3875 = vmatpush3.bf16.msra.mxu1 %v4103_v58 }
0x1e6f   : > { %3876 = vmatprep.subr.bf16.mxu1 %v4630_v6 }
0x1e72   : > { %3877 = vmatpush3.bf16.msra.mxu1 %v4104_v61  ;;  %v3306_v61 = vld [vmem:[%s4933_s11] sm:$0x3] }
0x1e73   : > { %3878 = vmatprep.subr.bf16.mxu1 %v4630_v6 }
0x1e76   : > { %3879 = vmatpush3.bf16.msra.mxu1 %v4105_v11  ;;  %v3336_v11 = vrot.slane %v3306_v61, %v4385_v50 }
0x1e77   : > { %3880 = vmatprep.subr.bf16.mxu1 %v4630_v6 }
0x1e7a   : > { %3881 = vmatpush3.bf16.msra.mxu1 %v4106_v43 }
0x1e7b   : > { %3882 = vmatprep.subr.bf16.mxu1 %v4630_v6 }
0x1e7e   : > { %3883 = vmatpush3.bf16.msra.mxu1 %v4107_v14  ;;  %v3342_v14 = vrot.slane %v3306_v61, %v4395_v55 }
0x1e7f   : > { %3884 = vmatprep.subr.bf16.mxu1 %v4630_v6 }
0x1e82   : > { %3885 = vmatpush3.bf16.msra.mxu1 %v4108_v45 }
0x1e83   : > { %3886 = vmatprep.subr.bf16.mxu1 %v4630_v6 }
0x1e86   : > { %3887 = vmatpush3.bf16.msra.mxu1 %v4109_v38 }
0x1f3c   : > { %v3062_v34 = vpop.f32.mrb[48].mxu1 }
0x1f3d   : > { %v3069_v13 = vadd.f32 %v3062_v34, %v2819_v63  ;;  %v3862_v4 = vpop.f32.mrb[49].mxu1 }
0x1f3e   : > { %v3065_v19 = vpop.f32.mrb[50].mxu1 }
0x1f3f   : > { %v3075_v20 = vadd.f32 %v3074_v2, %v3069_v13  ;;  %v3070_v21 = vadd.f32 %v3065_v19, %v2820_v7  ;;  %v3863_v22 = vpop.f32.mrb[51].mxu1 }
0x1f41   : > { %v3081_v24 = vmul.f32 %v3080_v18, %v3075_v20  ;;  %v3076_v25 = vadd.f32 %v3074_v2, %v3070_v21 }
0x1f43   : > { %v3082_v27 = vmul.f32 %v3080_v18, %v3076_v25  ;;  %v4837_v12 = vadd.f32 %v3081_v24, %v4656_v1 }
0x1f45   : > { %v3085_v15 = vsel %vm603_vm1, %v4837_v12, 0.0  ;;  %v4842_v29 = vadd.f32 %v3082_v27, %v4659_v5 }
0x1f46   : > { %3086 = vadd.xlane.f32.xlu0 %v3085_v15 }
0x1f47   : > { %v3088_v17 = vsel %vm603_vm1, %v4842_v29, 0.0 }
0x1f4a   : > { %3089 = vadd.xlane.f32.xlu0 %v3088_v17 }
0x1fd3   : > { %v3087_v30 = vpop.xlane.xlu0 %3086 }
0x1fd4   : > { %v3091_v31 = vmul.f32 0.03125, %v3087_v30 }
0x1fd6   : > { %v3093_v33 = vsub.f32 %v4837_v12, %v3091_v31 }
0x1fd7   : > { %v3090_v35 = vpop.xlane.xlu0 %3089 }
0x1fd8   : > { %v3092_v36 = vmul.f32 0.03125, %v3090_v35  ;;  %v3095_v37 = vmul.f32 %v3093_v33, %v3093_v33 }
0x1fda   : > { %v3094_v1 = vsub.f32 %v4842_v29, %v3092_v36  ;;  %v3097_v39 = vsel %vm603_vm1, %v3095_v37, 0.0 }
0x1fdb   : > { %3098 = vadd.xlane.f32.xlu0 %v3097_v39  ;;  %v3208_v39 = vrot.slane %v4679_v28, %v1839_v48 }
0x1fdc   : > { %v3096_v40 = vmul.f32 %v3094_v1, %v3094_v1 }
0x1fde   : > { %v3100_v5 = vsel %vm603_vm1, %v3096_v40, 0.0  ;;  %v3301_v40 = vrot.slane %v4679_v28, %v1932_v53 }
0x1fdf   : > { %3101 = vadd.xlane.f32.xlu0 %v3100_v5 }
0x2068   : > { %v3099_v47 = vpop.xlane.xlu0 %3098 }
0x2069   : > { %v3103_v56 = vmul.f32 0.03125, %v3099_v47 }
0x206b   : > { %v3105_v16 = vadd.f32 1e-06, %v3103_v56 }
0x206c   : > { %v3102_v44 = vpop.xlane.xlu0 %3101 }
0x206d   : > { %4190 = vrsqrt.f32 %v3105_v16  ;;  %v3104_v57 = vmul.f32 0.03125, %v3102_v44 }
0x206f   : > { %v3106_v42 = vadd.f32 1e-06, %v3104_v57 }
0x2071   : > { %4192 = vrsqrt.f32 %v3106_v42 }
0x2077   : > { %v4191_v8 = vpop.eup %4190 }
0x2078   : > { %v3109_v54 = vmul.f32 %v4191_v8, %v3093_v33 }
0x207a   : > { %v3115_v62 = vmul.f32 %v3114_v59, %v3109_v54 }
0x207b   : > { %v4193_v60 = vpop.eup %4192 }
0x207c   : > { %v3110_v63 = vmul.f32 %v4193_v60, %v3094_v1  ;;  %v3121_v7 = vadd.f32 %v3120_v0, %v3115_v62 }
0x207e   : > { %v3116_v3 = vmul.f32 %v3114_v59, %v3110_v63 }
0x2080   : > { %v3122_v51 = vadd.f32 %v3120_v0, %v3116_v3 }
0x2082   : > { %v3123_v9 = vpack.c.bf16 %v3122_v51, %v3121_v7 }
0x2084   : > { %3869 = vmatmul.mubr.msk.bf16.vlgmr.msra.gmra.mrb[36].mxu0 %vm603_vm1, %v3123_v9 }
0x2157   : > { %v3179_v46 = vpop.f32.mrb[36].mxu0 }
0x2158   : > { %v3180_v52 = vadd.f32 %v3535_v41, %v3179_v46  ;;  %v3870_v32 = vpop.f32.mrb[37].mxu0 }
0x2159   : > { %v3182_v2 = vpop.f32.mrb[38].mxu0 }
0x215a   : > { %v3188_v34 = vmul.f32 0.044715, %v3180_v52  ;;  %v3183_v13 = vadd.f32 %v3535_v41, %v3182_v2  ;;  %v3871_v18 = vpop.f32.mrb[39].mxu0  ;;  %v3186_v31 = vmul.f32 0.5, %v3180_v52 }
0x215c   : > { %v3190_v4 = vmul.f32 %v3188_v34, %v3180_v52  ;;  %v3189_v19 = vmul.f32 0.044715, %v3183_v13  ;;  %v3187_v33 = vmul.f32 0.5, %v3183_v13 }
0x215e   : > { %v3192_v20 = vmul.f32 %v3190_v4, %v3180_v52  ;;  %v3191_v21 = vmul.f32 %v3189_v19, %v3183_v13 }
0x2160   : > { %v3194_v22 = vadd.f32 %v3192_v20, %v3180_v52  ;;  %v3193_v24 = vmul.f32 %v3191_v21, %v3183_v13 }
0x2162   : > { %v3196_v25 = vmul.f32 0.7978846, %v3194_v22  ;;  %v3195_v6 = vadd.f32 %v3193_v24, %v3183_v13 }
0x2164   : > { %4194 = vtanh.f32 %v3196_v25  ;;  %v3197_v27 = vmul.f32 0.7978846, %v3195_v6 }
0x2166   : > { %4196 = vtanh.f32 %v3197_v27 }
0x216e   : > { %v4195_v15 = vpop.eup %4194 }
0x216f   : > { %v3200_v17 = vadd.f32 1.0, %v4195_v15 }
0x2170   : > { %v4197_v30 = vpop.eup %4196 }
0x2171   : > { %v3201_v35 = vadd.f32 1.0, %v4197_v30  ;;  %v3202_v36 = vmul.f32 %v3200_v17, %v3186_v31 }
0x2173   : > { %v3203_v37 = vmul.f32 %v3201_v35, %v3187_v33 }
0x2175   : > { %v3204_v1 = vpack.c.bf16 %v3203_v37, %v3202_v36 }
0x2177   : > { %3889 = vmatmul.mubr.bf16.vlgmr.msra.gmra.mrb[52].mxu1 %v3204_v1 }
0x224a   : > { %v3291_v5 = vpop.f32.mrb[52].mxu1 }
0x224b   : > { %v3292_v23 = vadd.f32 %v3291_v5, %v3208_v39  ;;  %v3890_v26 = vpop.f32.mrb[53].mxu1 }
0x224c   : > { %v3294_v47 = vpop.f32.mrb[54].mxu1 }
0x224d   : > { %v3302_v56 = vmul.f32 %v3301_v40, %v3292_v23  ;;  %v3295_v16 = vadd.f32 %v3294_v47, %v3208_v39  ;;  %v3891_v44 = vpop.f32.mrb[55].mxu1 }
0x224f   : > { %v3303_v57 = vmul.f32 %v3301_v40, %v3295_v16  ;;  %v3304_v42 = vadd.f32 %v3302_v56, %v4837_v12 }
0x2251   : > { %v3307_v8 = vsel %vm603_vm1, %v3304_v42, 0.0  ;;  %v3305_v59 = vadd.f32 %v3303_v57, %v4842_v29 }
0x2252   : > { %3308 = vadd.xlane.f32.xlu1 %v3307_v8 }
0x2253   : > { %v3310_v48 = vsel %vm603_vm1, %v3305_v59, 0.0 }
0x2254   : > { %3311 = vadd.xlane.f32.xlu0 %v3310_v48 }
0x22df   : > { %v3309_v49 = vpop.xlane.xlu1 %3308 }
0x22e0   : > { %v3313_v53 = vmul.f32 0.03125, %v3309_v49 }
0x22e1   : > { %v3312_v28 = vpop.xlane.xlu0 %3311 }
0x22e2   : > { %v3315_v54 = vsub.f32 %v3304_v42, %v3313_v53  ;;  %v3314_v60 = vmul.f32 0.03125, %v3312_v28 }
0x22e4   : > { %v3316_v62 = vsub.f32 %v3305_v59, %v3314_v60  ;;  %v3317_v63 = vmul.f32 %v3315_v54, %v3315_v54 }
0x22e6   : > { %v3319_v0 = vsel %vm603_vm1, %v3317_v63, 0.0  ;;  %v3318_v3 = vmul.f32 %v3316_v62, %v3316_v62 }
0x22e7   : > { %3320 = vadd.xlane.f32.xlu0 %v3319_v0 }
0x22e8   : > { %v3322_v12 = vsel %vm603_vm1, %v3318_v3, 0.0 }
0x22eb   : > { %3323 = vadd.xlane.f32.xlu0 %v3322_v12 }
0x2374   : > { %v3321_v7 = vpop.xlane.xlu0 %3320 }
0x2375   : > { %v3325_v29 = vmul.f32 0.03125, %v3321_v7 }
0x2377   : > { %v3327_v51 = vadd.f32 1e-06, %v3325_v29 }
0x2378   : > { %v3324_v9 = vpop.xlane.xlu0 %3323 }
0x2379   : > { %4198 = vrsqrt.f32 %v3327_v51  ;;  %v3326_v10 = vmul.f32 0.03125, %v3324_v9 }
0x237b   : > { %v3328_v58 = vadd.f32 1e-06, %v3326_v10 }
0x237d   : > { %4200 = vrsqrt.f32 %v3328_v58 }
0x2383   : > { %v4199_v43 = vpop.eup %4198 }
0x2384   : > { %v3331_v45 = vmul.f32 %v4199_v43, %v3315_v54 }
0x2386   : > { %v3337_v38 = vmul.f32 %v3336_v11, %v3331_v45 }
0x2387   : > { %v4201_v41 = vpop.eup %4200 }
0x2388   : > { %v3343_v46 = vadd.f32 %v3342_v14, %v3337_v38  ;;  %v3332_v52 = vmul.f32 %v4201_v41, %v3316_v62 }
0x238a   : > { %3347 = vst.msk [vmem:[%s4312_s16] sm:$0xff] %vm603_vm1, %v3343_v46  ;;  %v3338_v32 = vmul.f32 %v3336_v11, %v3332_v52 }
0x238c   : > { %v3344_v2 = vadd.f32 %v3342_v14, %v3338_v32 }
0x238e   : > { %3348 = vst.msk [vmem:[%s4312_s16 + $0x8] sm:$0xff] %vm603_vm1, %v3344_v2 }
0x238f PF: > { %s22_s21 = sadd.s32 1, %s4211_s21  }
0x2390   : > { %p19_p4 = scmp.ge.s32.totalorder %s22_s21, 4  }
0x2392   :  { %21 = sbr.rel (!%p19_p4) target bundleno = 1 (0x1), region = 105 }

</bundles_post_ra>
